<compile_context>
chip_gen: v5e
topology: v5e:2x2
jax: 0.10.0
libtpu: 0.0.40
codegen_flags: <defaults>
</compile_context>

<pallas_src>
import functools

import jax
import jax.numpy as jnp
from jax.experimental import pallas as pl
from jax.experimental.pallas import tpu as pltpu


def _round_up(n, m):
    return ((n + m - 1) // m) * m


# ----------------------------------------------------------------------------
# Pallas kernel: tanh(100*pos) -> (a+b+1)-wide 2-channel conv (VPU FMAs over
# rolled taps) -> ReLU -> 1x1 conv -> ReLU -> 1x1 conv -> clamp[0, 0.5] ->
# flux-difference update.  Everything stays in lane-dense [TB, Lp] layout.
# ----------------------------------------------------------------------------
def _flow_kernel(w1_ref, b1_ref, w2_ref, b2_ref, w3_ref, b3_ref,
                 xp_ref, pp_ref, xout_ref, flow_ref,
                 *, a, b, hidden, lp, dt, dx):
    K = a + b + 1
    xp = xp_ref[...]                        # [TB, Lp]  edge-replicate-padded x
    pp = jnp.tanh(100.0 * pp_ref[...])      # [TB, Lp]  tanh(100*pos), padded

    # Stencil taps: tap(v, k)[:, j] == v[:, j + k] (circular; the wrap only
    # touches lanes j >= L which are alignment padding, discarded in wrapper).
    def tap(v, k):
        return v if k == 0 else pltpu.roll(v, lp - k, axis=1)

    tx = [tap(xp, k) for k in range(K)]     # channel 0 taps
    tp = [tap(pp, k) for k in range(K)]     # channel 1 taps

    # Conv1: in_channels=2, kernel=K, out=hidden  (scalar-weight VPU FMAs).
    # w1 flat index = h*2*K + c*K + k  (row-major [H, 2, K]).
    h = []
    for hh in range(hidden):
        base = hh * 2 * K
        acc = b1_ref[hh] + w1_ref[base] * tx[0]
        for k in range(1, K):
            acc = acc + w1_ref[base + k] * tx[k]
        for k in range(K):
            acc = acc + w1_ref[base + K + k] * tp[k]
        h.append(jnp.maximum(acc, 0.0))

    # fc_0: 1x1 conv hidden -> hidden, ReLU.  w2 flat index = g*H + h.
    h2 = []
    for g in range(hidden):
        acc = b2_ref[g] + w2_ref[g * hidden] * h[0]
        for hh in range(1, hidden):
            acc = acc + w2_ref[g * hidden + hh] * h[hh]
        h2.append(jnp.maximum(acc, 0.0))

    # fc_end: 1x1 conv hidden -> 1, then clamp to [0, 0.5].
    acc = b3_ref[0] + w3_ref[0] * h2[0]
    for hh in range(1, hidden):
        acc = acc + w3_ref[hh] * h2[hh]
    flow = jnp.clip(acc, 0.0, 0.5)          # [TB, Lp]; lane j = flux at cell j

    # Flux-difference update: x[j] - dt/dx * (flow[j] - flow[j-1]); the
    # PyTorch code prepends flow[0], so the j==0 difference is exactly 0.
    x_cells = tx[a]                          # original x at lane j (j < L)
    lane = jax.lax.broadcasted_iota(jnp.int32, flow.shape, 1)
    diff = jnp.where(lane == 0, 0.0, flow - pltpu.roll(flow, 1, axis=1))
    xout_ref[...] = x_cells - (dt / dx) * diff
    flow_ref[...] = flow


# ----------------------------------------------------------------------------
# Parameter init (deterministic, PyTorch Conv1d-style uniform bounds) and
# conversion into the kernel-friendly flattened SMEM layout.
# ----------------------------------------------------------------------------
def init_params(key, stencil, hidden=10, in_channels=2):
    a, b = stencil
    K = a + b + 1
    keys = jax.random.split(key, 6)

    def u(k, shape, fan_in):
        bound = 1.0 / jnp.sqrt(jnp.float32(fan_in))
        return jax.random.uniform(k, shape, jnp.float32, -bound, bound)

    # PyTorch layouts: Conv1d weight = [out, in, kernel]
    return dict(
        w1=u(keys[0], (hidden, in_channels, K), in_channels * K),
        b1=u(keys[1], (hidden,), in_channels * K),
        w2=u(keys[2], (hidden, hidden, 1), hidden),
        b2=u(keys[3], (hidden,), hidden),
        w3=u(keys[4], (1, hidden, 1), hidden),
        b3=u(keys[5], (1,), hidden),
    )


def to_kernel_params(p):
    """Flatten PyTorch-layout params into 1-D f32 arrays for SMEM residency."""
    H = p["b1"].shape[0]
    w1f = p["w1"].astype(jnp.float32).reshape(-1)             # [(h,c,k)]
    b1f = p["b1"].astype(jnp.float32).reshape(-1)             # [H]
    w2f = p["w2"][:, :, 0].astype(jnp.float32).reshape(-1)    # [(g,h)]
    b2f = p["b2"].astype(jnp.float32).reshape(-1)             # [H]
    w3f = p["w3"][0, :, 0].astype(jnp.float32).reshape(-1)    # [H]
    b3f = p["b3"].astype(jnp.float32).reshape(-1)             # [1]
    return (w1f, b1f, w2f, b2f, w3f, b3f), H


# ----------------------------------------------------------------------------
# Wrapper: single combined pad (edge replication + 128-lane alignment),
# batch-row tiling, pallas_call, and the cheap final reshapes/concat (glue).
# ----------------------------------------------------------------------------
def flow_model_x_forward(params, x, pos, *, stencil, dt=1.0, dx=1.0,
                         max_block_rows=64):
    a, b = stencil
    K = a + b + 1
    B, _, L, _ = x.shape
    (w1f, b1f, w2f, b2f, w3f, b3f), H = to_kernel_params(params)

    x2 = x.reshape(B, L).astype(jnp.float32)
    pos2 = pos.reshape(B, L).astype(jnp.float32)

    # One pad covers both the PyTorch edge replication (a left / b right) and
    # the lane alignment to a multiple of 128 (extra lanes -> discarded).
    lp = _round_up(a + L + b, 128)

    def pad_spatial(v):
        left = jnp.broadcast_to(v[:, :1], (B, a))
        right = jnp.broadcast_to(v[:, L - 1:L], (B, lp - a - L))
        return jnp.concatenate([left, v, right], axis=1)

    xp = pad_spatial(x2)
    pp = pad_spatial(pos2)

    # Pad batch rows to a sublane-aligned tile size; grid over row tiles.
    tb = min(_round_up(B, 8), max_block_rows)
    bp = _round_up(B, tb)
    if bp != B:
        pad = jnp.zeros((bp - B, lp), jnp.float32)
        xp = jnp.concatenate([xp, pad], axis=0)
        pp = jnp.concatenate([pp, pad], axis=0)

    kernel = functools.partial(_flow_kernel, a=a, b=b, hidden=H, lp=lp,
                               dt=float(dt), dx=float(dx))

    smem = pl.BlockSpec(memory_space=pltpu.MemorySpace.SMEM)   # resident params
    tile = pl.BlockSpec((tb, lp), lambda i: (i, 0))            # row tiles

    flops_per_elem = 2 * (2 * K * H + H * H + H) + 8
    cost = pl.CostEstimate(
        flops=int(bp * lp * flops_per_elem),
        transcendentals=int(bp * lp),
        bytes_accessed=int(4 * bp * lp * 4),
    )

    xout_p, flow_p = pl.pallas_call(
        kernel,
        grid=(bp // tb,),
        out_shape=(jax.ShapeDtypeStruct((bp, lp), jnp.float32),
                   jax.ShapeDtypeStruct((bp, lp), jnp.float32)),
        in_specs=[smem] * 6 + [tile, tile],
        out_specs=(tile, tile),
        compiler_params=pltpu.CompilerParams(
            dimension_semantics=("parallel",),
            vmem_limit_bytes=32 * 1024 * 1024),
        cost_estimate=cost,
    )(w1f, b1f, w2f, b2f, w3f, b3f, xp, pp)

    xout = xout_p[:B, :L]
    flow = flow_p[:B, :L]
    flow_r = jnp.concatenate([flow[:, :1], flow], axis=1)      # [B, L+1] (glue)
    return xout.reshape(B, 1, L, 1), flow_r.reshape(B, 1, L + 1, 1)


# ----------------------------------------------------------------------------
# Pure-JAX reference of the PyTorch forward (for numerical verification).
# ----------------------------------------------------------------------------
def reference_forward(p, x, pos, *, stencil, dt=1.0, dx=1.0):
    a, b = stencil
    K = a + b + 1
    B, _, L, _ = x.shape
    pos_t = jnp.tanh(100.0 * pos)
    feat = jnp.concatenate([x, pos_t], axis=-1)[:, 0]                    # [B, L, 2]
    f_pad = jnp.concatenate(
        [jnp.repeat(feat[:, :1], a, axis=1), feat,
         jnp.repeat(feat[:, -1:], b, axis=1)], axis=1)                   # [B, L+a+b, 2]
    wins = jnp.stack([f_pad[:, i:i + K, :] for i in range(L)], axis=1)   # [B, L, K, 2]
    h = jnp.maximum(jnp.einsum('blkc,hck->blh', wins, p["w1"]) + p["b1"], 0.0)
    h2 = jnp.maximum(jnp.einsum('blh,gh->blg', h, p["w2"][:, :, 0]) + p["b2"], 0.0)
    o = jnp.einsum('blh,oh->blo', h2, p["w3"][:, :, 0]) + p["b3"]
    flow = jnp.clip(o[..., 0], 0.0, 0.5)                                 # [B, L]
    flow_r = jnp.concatenate([flow[:, :1], flow], axis=1)                # [B, L+1]
    x_out = x[:, 0, :, 0] - dt / dx * (flow_r[:, 1:] - flow_r[:, :-1])
    return x_out.reshape(B, 1, L, 1), flow_r.reshape(B, 1, L + 1, 1)


if __name__ == "__main__":
    B, L = 2, 16
    stencil = (1, 2)
    hidden = 10
    dt, dx = 1.0, 1.0

    key = jax.random.PRNGKey(0)
    kx, kp, kw = jax.random.split(key, 3)
    x = jax.random.uniform(kx, (B, 1, L, 1), jnp.float32)                 # densities
    pos = jax.random.uniform(kp, (B, 1, L, 1), jnp.float32) - 0.5         # positions

    params = init_params(kw, stencil, hidden=hidden)

    x_out, flow_r = flow_model_x_forward(params, x, pos, stencil=stencil, dt=dt, dx=dx)
    jax.block_until_ready((x_out, flow_r))

    x_ref, flow_ref = reference_forward(params, x, pos, stencil=stencil, dt=dt, dx=dx)
    assert x_out.shape == (B, 1, L, 1) and flow_r.shape == (B, 1, L + 1, 1)
    assert jnp.allclose(x_out, x_ref, rtol=1e-5, atol=1e-5)
    assert jnp.allclose(flow_r, flow_ref, rtol=1e-5, atol=1e-5)

    print("KERNEL_OK")
</pallas_src>

<mosaic_0001>
module attributes {stable_mosaic.version = 11 : i64} {
  func.func @_flow_kernel(%arg0: i32, %arg1: memref<80xf32, #tpu.memory_space<smem>>, %arg2: memref<10xf32, #tpu.memory_space<smem>>, %arg3: memref<100xf32, #tpu.memory_space<smem>>, %arg4: memref<10xf32, #tpu.memory_space<smem>>, %arg5: memref<10xf32, #tpu.memory_space<smem>>, %arg6: memref<1xf32, #tpu.memory_space<smem>>, %arg7: memref<8x128xf32, #tpu.memory_space<vmem>>, %arg8: memref<8x128xf32, #tpu.memory_space<vmem>>, %arg9: memref<8x128xf32, #tpu.memory_space<vmem>>, %arg10: memref<8x128xf32, #tpu.memory_space<vmem>>) attributes {dimension_semantics = [#tpu.dimension_semantics<parallel>], iteration_bounds = array<i64: 1>, scalar_prefetch = 0 : i64, scratch_operands = 0 : i64, tpu.core_type = #tpu.core_type<tc>, window_params = [{transform_indices = @transform_0, window_bounds = array<i64: 80>}, {transform_indices = @transform_1, window_bounds = array<i64: 10>}, {transform_indices = @transform_2, window_bounds = array<i64: 100>}, {transform_indices = @transform_3, window_bounds = array<i64: 10>}, {transform_indices = @transform_4, window_bounds = array<i64: 10>}, {transform_indices = @transform_5, window_bounds = array<i64: 1>}, {transform_indices = @transform_6, window_bounds = array<i64: 8, 128>}, {transform_indices = @transform_7, window_bounds = array<i64: 8, 128>}, {transform_indices = @transform_8, window_bounds = array<i64: 8, 128>}, {transform_indices = @transform_9, window_bounds = array<i64: 8, 128>}]} {
    %c0 = arith.constant 0 : index
    %c0_0 = arith.constant 0 : index
    %0 = vector.load %arg7[%c0, %c0_0] : memref<8x128xf32, #tpu.memory_space<vmem>>, vector<8x128xf32>
    %c0_1 = arith.constant 0 : index
    %c0_2 = arith.constant 0 : index
    %1 = vector.load %arg8[%c0_1, %c0_2] : memref<8x128xf32, #tpu.memory_space<vmem>>, vector<8x128xf32>
    %cst = arith.constant 1.000000e+02 : f32
    %2 = vector.broadcast %cst : f32 to vector<8x128xf32>
    %3 = arith.mulf %2, %1 : vector<8x128xf32>
    %4 = math.tanh %3 : vector<8x128xf32>
    %c127_i32 = arith.constant 127 : i32
    %5 = tpu.dynamic_rotate %0 by %c127_i32 dim 1 : vector<8x128xf32>, i32 -> vector<8x128xf32>
    %c126_i32 = arith.constant 126 : i32
    %6 = tpu.dynamic_rotate %0 by %c126_i32 dim 1 : vector<8x128xf32>, i32 -> vector<8x128xf32>
    %c125_i32 = arith.constant 125 : i32
    %7 = tpu.dynamic_rotate %0 by %c125_i32 dim 1 : vector<8x128xf32>, i32 -> vector<8x128xf32>
    %c127_i32_3 = arith.constant 127 : i32
    %8 = tpu.dynamic_rotate %4 by %c127_i32_3 dim 1 : vector<8x128xf32>, i32 -> vector<8x128xf32>
    %c126_i32_4 = arith.constant 126 : i32
    %9 = tpu.dynamic_rotate %4 by %c126_i32_4 dim 1 : vector<8x128xf32>, i32 -> vector<8x128xf32>
    %c125_i32_5 = arith.constant 125 : i32
    %10 = tpu.dynamic_rotate %4 by %c125_i32_5 dim 1 : vector<8x128xf32>, i32 -> vector<8x128xf32>
    %c0_6 = arith.constant 0 : index
    %11 = memref.load %arg2[%c0_6] : memref<10xf32, #tpu.memory_space<smem>>
    %c0_7 = arith.constant 0 : index
    %12 = memref.load %arg1[%c0_7] : memref<80xf32, #tpu.memory_space<smem>>
    %13 = vector.broadcast %12 : f32 to vector<8x128xf32>
    %14 = arith.mulf %13, %0 : vector<8x128xf32>
    %15 = vector.broadcast %11 : f32 to vector<8x128xf32>
    %16 = arith.addf %15, %14 : vector<8x128xf32>
    %c1 = arith.constant 1 : index
    %17 = memref.load %arg1[%c1] : memref<80xf32, #tpu.memory_space<smem>>
    %18 = vector.broadcast %17 : f32 to vector<8x128xf32>
    %19 = arith.mulf %18, %5 : vector<8x128xf32>
    %20 = arith.addf %16, %19 : vector<8x128xf32>
    %c2 = arith.constant 2 : index
    %21 = memref.load %arg1[%c2] : memref<80xf32, #tpu.memory_space<smem>>
    %22 = vector.broadcast %21 : f32 to vector<8x128xf32>
    %23 = arith.mulf %22, %6 : vector<8x128xf32>
    %24 = arith.addf %20, %23 : vector<8x128xf32>
    %c3 = arith.constant 3 : index
    %25 = memref.load %arg1[%c3] : memref<80xf32, #tpu.memory_space<smem>>
    %26 = vector.broadcast %25 : f32 to vector<8x128xf32>
    %27 = arith.mulf %26, %7 : vector<8x128xf32>
    %28 = arith.addf %24, %27 : vector<8x128xf32>
    %c4 = arith.constant 4 : index
    %29 = memref.load %arg1[%c4] : memref<80xf32, #tpu.memory_space<smem>>
    %30 = vector.broadcast %29 : f32 to vector<8x128xf32>
    %31 = arith.mulf %30, %4 : vector<8x128xf32>
    %32 = arith.addf %28, %31 : vector<8x128xf32>
    %c5 = arith.constant 5 : index
    %33 = memref.load %arg1[%c5] : memref<80xf32, #tpu.memory_space<smem>>
    %34 = vector.broadcast %33 : f32 to vector<8x128xf32>
    %35 = arith.mulf %34, %8 : vector<8x128xf32>
    %36 = arith.addf %32, %35 : vector<8x128xf32>
    %c6 = arith.constant 6 : index
    %37 = memref.load %arg1[%c6] : memref<80xf32, #tpu.memory_space<smem>>
    %38 = vector.broadcast %37 : f32 to vector<8x128xf32>
    %39 = arith.mulf %38, %9 : vector<8x128xf32>
    %40 = arith.addf %36, %39 : vector<8x128xf32>
    %c7 = arith.constant 7 : index
    %41 = memref.load %arg1[%c7] : memref<80xf32, #tpu.memory_space<smem>>
    %42 = vector.broadcast %41 : f32 to vector<8x128xf32>
    %43 = arith.mulf %42, %10 : vector<8x128xf32>
    %44 = arith.addf %40, %43 : vector<8x128xf32>
    %cst_8 = arith.constant 0.000000e+00 : f32
    %45 = vector.broadcast %cst_8 : f32 to vector<8x128xf32>
    %46 = arith.maximumf %44, %45 : vector<8x128xf32>
    %c1_9 = arith.constant 1 : index
    %47 = memref.load %arg2[%c1_9] : memref<10xf32, #tpu.memory_space<smem>>
    %c8 = arith.constant 8 : index
    %48 = memref.load %arg1[%c8] : memref<80xf32, #tpu.memory_space<smem>>
    %49 = vector.broadcast %48 : f32 to vector<8x128xf32>
    %50 = arith.mulf %49, %0 : vector<8x128xf32>
    %51 = vector.broadcast %47 : f32 to vector<8x128xf32>
    %52 = arith.addf %51, %50 : vector<8x128xf32>
    %c9 = arith.constant 9 : index
    %53 = memref.load %arg1[%c9] : memref<80xf32, #tpu.memory_space<smem>>
    %54 = vector.broadcast %53 : f32 to vector<8x128xf32>
    %55 = arith.mulf %54, %5 : vector<8x128xf32>
    %56 = arith.addf %52, %55 : vector<8x128xf32>
    %c10 = arith.constant 10 : index
    %57 = memref.load %arg1[%c10] : memref<80xf32, #tpu.memory_space<smem>>
    %58 = vector.broadcast %57 : f32 to vector<8x128xf32>
    %59 = arith.mulf %58, %6 : vector<8x128xf32>
    %60 = arith.addf %56, %59 : vector<8x128xf32>
    %c11 = arith.constant 11 : index
    %61 = memref.load %arg1[%c11] : memref<80xf32, #tpu.memory_space<smem>>
    %62 = vector.broadcast %61 : f32 to vector<8x128xf32>
    %63 = arith.mulf %62, %7 : vector<8x128xf32>
    %64 = arith.addf %60, %63 : vector<8x128xf32>
    %c12 = arith.constant 12 : index
    %65 = memref.load %arg1[%c12] : memref<80xf32, #tpu.memory_space<smem>>
    %66 = vector.broadcast %65 : f32 to vector<8x128xf32>
    %67 = arith.mulf %66, %4 : vector<8x128xf32>
    %68 = arith.addf %64, %67 : vector<8x128xf32>
    %c13 = arith.constant 13 : index
    %69 = memref.load %arg1[%c13] : memref<80xf32, #tpu.memory_space<smem>>
    %70 = vector.broadcast %69 : f32 to vector<8x128xf32>
    %71 = arith.mulf %70, %8 : vector<8x128xf32>
    %72 = arith.addf %68, %71 : vector<8x128xf32>
    %c14 = arith.constant 14 : index
    %73 = memref.load %arg1[%c14] : memref<80xf32, #tpu.memory_space<smem>>
    %74 = vector.broadcast %73 : f32 to vector<8x128xf32>
    %75 = arith.mulf %74, %9 : vector<8x128xf32>
    %76 = arith.addf %72, %75 : vector<8x128xf32>
    %c15 = arith.constant 15 : index
    %77 = memref.load %arg1[%c15] : memref<80xf32, #tpu.memory_space<smem>>
    %78 = vector.broadcast %77 : f32 to vector<8x128xf32>
    %79 = arith.mulf %78, %10 : vector<8x128xf32>
    %80 = arith.addf %76, %79 : vector<8x128xf32>
    %cst_10 = arith.constant 0.000000e+00 : f32
    %81 = vector.broadcast %cst_10 : f32 to vector<8x128xf32>
    %82 = arith.maximumf %80, %81 : vector<8x128xf32>
    %c2_11 = arith.constant 2 : index
    %83 = memref.load %arg2[%c2_11] : memref<10xf32, #tpu.memory_space<smem>>
    %c16 = arith.constant 16 : index
    %84 = memref.load %arg1[%c16] : memref<80xf32, #tpu.memory_space<smem>>
    %85 = vector.broadcast %84 : f32 to vector<8x128xf32>
    %86 = arith.mulf %85, %0 : vector<8x128xf32>
    %87 = vector.broadcast %83 : f32 to vector<8x128xf32>
    %88 = arith.addf %87, %86 : vector<8x128xf32>
    %c17 = arith.constant 17 : index
    %89 = memref.load %arg1[%c17] : memref<80xf32, #tpu.memory_space<smem>>
    %90 = vector.broadcast %89 : f32 to vector<8x128xf32>
    %91 = arith.mulf %90, %5 : vector<8x128xf32>
    %92 = arith.addf %88, %91 : vector<8x128xf32>
    %c18 = arith.constant 18 : index
    %93 = memref.load %arg1[%c18] : memref<80xf32, #tpu.memory_space<smem>>
    %94 = vector.broadcast %93 : f32 to vector<8x128xf32>
    %95 = arith.mulf %94, %6 : vector<8x128xf32>
    %96 = arith.addf %92, %95 : vector<8x128xf32>
    %c19 = arith.constant 19 : index
    %97 = memref.load %arg1[%c19] : memref<80xf32, #tpu.memory_space<smem>>
    %98 = vector.broadcast %97 : f32 to vector<8x128xf32>
    %99 = arith.mulf %98, %7 : vector<8x128xf32>
    %100 = arith.addf %96, %99 : vector<8x128xf32>
    %c20 = arith.constant 20 : index
    %101 = memref.load %arg1[%c20] : memref<80xf32, #tpu.memory_space<smem>>
    %102 = vector.broadcast %101 : f32 to vector<8x128xf32>
    %103 = arith.mulf %102, %4 : vector<8x128xf32>
    %104 = arith.addf %100, %103 : vector<8x128xf32>
    %c21 = arith.constant 21 : index
    %105 = memref.load %arg1[%c21] : memref<80xf32, #tpu.memory_space<smem>>
    %106 = vector.broadcast %105 : f32 to vector<8x128xf32>
    %107 = arith.mulf %106, %8 : vector<8x128xf32>
    %108 = arith.addf %104, %107 : vector<8x128xf32>
    %c22 = arith.constant 22 : index
    %109 = memref.load %arg1[%c22] : memref<80xf32, #tpu.memory_space<smem>>
    %110 = vector.broadcast %109 : f32 to vector<8x128xf32>
    %111 = arith.mulf %110, %9 : vector<8x128xf32>
    %112 = arith.addf %108, %111 : vector<8x128xf32>
    %c23 = arith.constant 23 : index
    %113 = memref.load %arg1[%c23] : memref<80xf32, #tpu.memory_space<smem>>
    %114 = vector.broadcast %113 : f32 to vector<8x128xf32>
    %115 = arith.mulf %114, %10 : vector<8x128xf32>
    %116 = arith.addf %112, %115 : vector<8x128xf32>
    %cst_12 = arith.constant 0.000000e+00 : f32
    %117 = vector.broadcast %cst_12 : f32 to vector<8x128xf32>
    %118 = arith.maximumf %116, %117 : vector<8x128xf32>
    %c3_13 = arith.constant 3 : index
    %119 = memref.load %arg2[%c3_13] : memref<10xf32, #tpu.memory_space<smem>>
    %c24 = arith.constant 24 : index
    %120 = memref.load %arg1[%c24] : memref<80xf32, #tpu.memory_space<smem>>
    %121 = vector.broadcast %120 : f32 to vector<8x128xf32>
    %122 = arith.mulf %121, %0 : vector<8x128xf32>
    %123 = vector.broadcast %119 : f32 to vector<8x128xf32>
    %124 = arith.addf %123, %122 : vector<8x128xf32>
    %c25 = arith.constant 25 : index
    %125 = memref.load %arg1[%c25] : memref<80xf32, #tpu.memory_space<smem>>
    %126 = vector.broadcast %125 : f32 to vector<8x128xf32>
    %127 = arith.mulf %126, %5 : vector<8x128xf32>
    %128 = arith.addf %124, %127 : vector<8x128xf32>
    %c26 = arith.constant 26 : index
    %129 = memref.load %arg1[%c26] : memref<80xf32, #tpu.memory_space<smem>>
    %130 = vector.broadcast %129 : f32 to vector<8x128xf32>
    %131 = arith.mulf %130, %6 : vector<8x128xf32>
    %132 = arith.addf %128, %131 : vector<8x128xf32>
    %c27 = arith.constant 27 : index
    %133 = memref.load %arg1[%c27] : memref<80xf32, #tpu.memory_space<smem>>
    %134 = vector.broadcast %133 : f32 to vector<8x128xf32>
    %135 = arith.mulf %134, %7 : vector<8x128xf32>
    %136 = arith.addf %132, %135 : vector<8x128xf32>
    %c28 = arith.constant 28 : index
    %137 = memref.load %arg1[%c28] : memref<80xf32, #tpu.memory_space<smem>>
    %138 = vector.broadcast %137 : f32 to vector<8x128xf32>
    %139 = arith.mulf %138, %4 : vector<8x128xf32>
    %140 = arith.addf %136, %139 : vector<8x128xf32>
    %c29 = arith.constant 29 : index
    %141 = memref.load %arg1[%c29] : memref<80xf32, #tpu.memory_space<smem>>
    %142 = vector.broadcast %141 : f32 to vector<8x128xf32>
    %143 = arith.mulf %142, %8 : vector<8x128xf32>
    %144 = arith.addf %140, %143 : vector<8x128xf32>
    %c30 = arith.constant 30 : index
    %145 = memref.load %arg1[%c30] : memref<80xf32, #tpu.memory_space<smem>>
    %146 = vector.broadcast %145 : f32 to vector<8x128xf32>
    %147 = arith.mulf %146, %9 : vector<8x128xf32>
    %148 = arith.addf %144, %147 : vector<8x128xf32>
    %c31 = arith.constant 31 : index
    %149 = memref.load %arg1[%c31] : memref<80xf32, #tpu.memory_space<smem>>
    %150 = vector.broadcast %149 : f32 to vector<8x128xf32>
    %151 = arith.mulf %150, %10 : vector<8x128xf32>
    %152 = arith.addf %148, %151 : vector<8x128xf32>
    %cst_14 = arith.constant 0.000000e+00 : f32
    %153 = vector.broadcast %cst_14 : f32 to vector<8x128xf32>
    %154 = arith.maximumf %152, %153 : vector<8x128xf32>
    %c4_15 = arith.constant 4 : index
    %155 = memref.load %arg2[%c4_15] : memref<10xf32, #tpu.memory_space<smem>>
    %c32 = arith.constant 32 : index
    %156 = memref.load %arg1[%c32] : memref<80xf32, #tpu.memory_space<smem>>
    %157 = vector.broadcast %156 : f32 to vector<8x128xf32>
    %158 = arith.mulf %157, %0 : vector<8x128xf32>
    %159 = vector.broadcast %155 : f32 to vector<8x128xf32>
    %160 = arith.addf %159, %158 : vector<8x128xf32>
    %c33 = arith.constant 33 : index
    %161 = memref.load %arg1[%c33] : memref<80xf32, #tpu.memory_space<smem>>
    %162 = vector.broadcast %161 : f32 to vector<8x128xf32>
    %163 = arith.mulf %162, %5 : vector<8x128xf32>
    %164 = arith.addf %160, %163 : vector<8x128xf32>
    %c34 = arith.constant 34 : index
    %165 = memref.load %arg1[%c34] : memref<80xf32, #tpu.memory_space<smem>>
    %166 = vector.broadcast %165 : f32 to vector<8x128xf32>
    %167 = arith.mulf %166, %6 : vector<8x128xf32>
    %168 = arith.addf %164, %167 : vector<8x128xf32>
    %c35 = arith.constant 35 : index
    %169 = memref.load %arg1[%c35] : memref<80xf32, #tpu.memory_space<smem>>
    %170 = vector.broadcast %169 : f32 to vector<8x128xf32>
    %171 = arith.mulf %170, %7 : vector<8x128xf32>
    %172 = arith.addf %168, %171 : vector<8x128xf32>
    %c36 = arith.constant 36 : index
    %173 = memref.load %arg1[%c36] : memref<80xf32, #tpu.memory_space<smem>>
    %174 = vector.broadcast %173 : f32 to vector<8x128xf32>
    %175 = arith.mulf %174, %4 : vector<8x128xf32>
    %176 = arith.addf %172, %175 : vector<8x128xf32>
    %c37 = arith.constant 37 : index
    %177 = memref.load %arg1[%c37] : memref<80xf32, #tpu.memory_space<smem>>
    %178 = vector.broadcast %177 : f32 to vector<8x128xf32>
    %179 = arith.mulf %178, %8 : vector<8x128xf32>
    %180 = arith.addf %176, %179 : vector<8x128xf32>
    %c38 = arith.constant 38 : index
    %181 = memref.load %arg1[%c38] : memref<80xf32, #tpu.memory_space<smem>>
    %182 = vector.broadcast %181 : f32 to vector<8x128xf32>
    %183 = arith.mulf %182, %9 : vector<8x128xf32>
    %184 = arith.addf %180, %183 : vector<8x128xf32>
    %c39 = arith.constant 39 : index
    %185 = memref.load %arg1[%c39] : memref<80xf32, #tpu.memory_space<smem>>
    %186 = vector.broadcast %185 : f32 to vector<8x128xf32>
    %187 = arith.mulf %186, %10 : vector<8x128xf32>
    %188 = arith.addf %184, %187 : vector<8x128xf32>
    %cst_16 = arith.constant 0.000000e+00 : f32
    %189 = vector.broadcast %cst_16 : f32 to vector<8x128xf32>
    %190 = arith.maximumf %188, %189 : vector<8x128xf32>
    %c5_17 = arith.constant 5 : index
    %191 = memref.load %arg2[%c5_17] : memref<10xf32, #tpu.memory_space<smem>>
    %c40 = arith.constant 40 : index
    %192 = memref.load %arg1[%c40] : memref<80xf32, #tpu.memory_space<smem>>
    %193 = vector.broadcast %192 : f32 to vector<8x128xf32>
    %194 = arith.mulf %193, %0 : vector<8x128xf32>
    %195 = vector.broadcast %191 : f32 to vector<8x128xf32>
    %196 = arith.addf %195, %194 : vector<8x128xf32>
    %c41 = arith.constant 41 : index
    %197 = memref.load %arg1[%c41] : memref<80xf32, #tpu.memory_space<smem>>
    %198 = vector.broadcast %197 : f32 to vector<8x128xf32>
    %199 = arith.mulf %198, %5 : vector<8x128xf32>
    %200 = arith.addf %196, %199 : vector<8x128xf32>
    %c42 = arith.constant 42 : index
    %201 = memref.load %arg1[%c42] : memref<80xf32, #tpu.memory_space<smem>>
    %202 = vector.broadcast %201 : f32 to vector<8x128xf32>
    %203 = arith.mulf %202, %6 : vector<8x128xf32>
    %204 = arith.addf %200, %203 : vector<8x128xf32>
    %c43 = arith.constant 43 : index
    %205 = memref.load %arg1[%c43] : memref<80xf32, #tpu.memory_space<smem>>
    %206 = vector.broadcast %205 : f32 to vector<8x128xf32>
    %207 = arith.mulf %206, %7 : vector<8x128xf32>
    %208 = arith.addf %204, %207 : vector<8x128xf32>
    %c44 = arith.constant 44 : index
    %209 = memref.load %arg1[%c44] : memref<80xf32, #tpu.memory_space<smem>>
    %210 = vector.broadcast %209 : f32 to vector<8x128xf32>
    %211 = arith.mulf %210, %4 : vector<8x128xf32>
    %212 = arith.addf %208, %211 : vector<8x128xf32>
    %c45 = arith.constant 45 : index
    %213 = memref.load %arg1[%c45] : memref<80xf32, #tpu.memory_space<smem>>
    %214 = vector.broadcast %213 : f32 to vector<8x128xf32>
    %215 = arith.mulf %214, %8 : vector<8x128xf32>
    %216 = arith.addf %212, %215 : vector<8x128xf32>
    %c46 = arith.constant 46 : index
    %217 = memref.load %arg1[%c46] : memref<80xf32, #tpu.memory_space<smem>>
    %218 = vector.broadcast %217 : f32 to vector<8x128xf32>
    %219 = arith.mulf %218, %9 : vector<8x128xf32>
    %220 = arith.addf %216, %219 : vector<8x128xf32>
    %c47 = arith.constant 47 : index
    %221 = memref.load %arg1[%c47] : memref<80xf32, #tpu.memory_space<smem>>
    %222 = vector.broadcast %221 : f32 to vector<8x128xf32>
    %223 = arith.mulf %222, %10 : vector<8x128xf32>
    %224 = arith.addf %220, %223 : vector<8x128xf32>
    %cst_18 = arith.constant 0.000000e+00 : f32
    %225 = vector.broadcast %cst_18 : f32 to vector<8x128xf32>
    %226 = arith.maximumf %224, %225 : vector<8x128xf32>
    %c6_19 = arith.constant 6 : index
    %227 = memref.load %arg2[%c6_19] : memref<10xf32, #tpu.memory_space<smem>>
    %c48 = arith.constant 48 : index
    %228 = memref.load %arg1[%c48] : memref<80xf32, #tpu.memory_space<smem>>
    %229 = vector.broadcast %228 : f32 to vector<8x128xf32>
    %230 = arith.mulf %229, %0 : vector<8x128xf32>
    %231 = vector.broadcast %227 : f32 to vector<8x128xf32>
    %232 = arith.addf %231, %230 : vector<8x128xf32>
    %c49 = arith.constant 49 : index
    %233 = memref.load %arg1[%c49] : memref<80xf32, #tpu.memory_space<smem>>
    %234 = vector.broadcast %233 : f32 to vector<8x128xf32>
    %235 = arith.mulf %234, %5 : vector<8x128xf32>
    %236 = arith.addf %232, %235 : vector<8x128xf32>
    %c50 = arith.constant 50 : index
    %237 = memref.load %arg1[%c50] : memref<80xf32, #tpu.memory_space<smem>>
    %238 = vector.broadcast %237 : f32 to vector<8x128xf32>
    %239 = arith.mulf %238, %6 : vector<8x128xf32>
    %240 = arith.addf %236, %239 : vector<8x128xf32>
    %c51 = arith.constant 51 : index
    %241 = memref.load %arg1[%c51] : memref<80xf32, #tpu.memory_space<smem>>
    %242 = vector.broadcast %241 : f32 to vector<8x128xf32>
    %243 = arith.mulf %242, %7 : vector<8x128xf32>
    %244 = arith.addf %240, %243 : vector<8x128xf32>
    %c52 = arith.constant 52 : index
    %245 = memref.load %arg1[%c52] : memref<80xf32, #tpu.memory_space<smem>>
    %246 = vector.broadcast %245 : f32 to vector<8x128xf32>
    %247 = arith.mulf %246, %4 : vector<8x128xf32>
    %248 = arith.addf %244, %247 : vector<8x128xf32>
    %c53 = arith.constant 53 : index
    %249 = memref.load %arg1[%c53] : memref<80xf32, #tpu.memory_space<smem>>
    %250 = vector.broadcast %249 : f32 to vector<8x128xf32>
    %251 = arith.mulf %250, %8 : vector<8x128xf32>
    %252 = arith.addf %248, %251 : vector<8x128xf32>
    %c54 = arith.constant 54 : index
    %253 = memref.load %arg1[%c54] : memref<80xf32, #tpu.memory_space<smem>>
    %254 = vector.broadcast %253 : f32 to vector<8x128xf32>
    %255 = arith.mulf %254, %9 : vector<8x128xf32>
    %256 = arith.addf %252, %255 : vector<8x128xf32>
    %c55 = arith.constant 55 : index
    %257 = memref.load %arg1[%c55] : memref<80xf32, #tpu.memory_space<smem>>
    %258 = vector.broadcast %257 : f32 to vector<8x128xf32>
    %259 = arith.mulf %258, %10 : vector<8x128xf32>
    %260 = arith.addf %256, %259 : vector<8x128xf32>
    %cst_20 = arith.constant 0.000000e+00 : f32
    %261 = vector.broadcast %cst_20 : f32 to vector<8x128xf32>
    %262 = arith.maximumf %260, %261 : vector<8x128xf32>
    %c7_21 = arith.constant 7 : index
    %263 = memref.load %arg2[%c7_21] : memref<10xf32, #tpu.memory_space<smem>>
    %c56 = arith.constant 56 : index
    %264 = memref.load %arg1[%c56] : memref<80xf32, #tpu.memory_space<smem>>
    %265 = vector.broadcast %264 : f32 to vector<8x128xf32>
    %266 = arith.mulf %265, %0 : vector<8x128xf32>
    %267 = vector.broadcast %263 : f32 to vector<8x128xf32>
    %268 = arith.addf %267, %266 : vector<8x128xf32>
    %c57 = arith.constant 57 : index
    %269 = memref.load %arg1[%c57] : memref<80xf32, #tpu.memory_space<smem>>
    %270 = vector.broadcast %269 : f32 to vector<8x128xf32>
    %271 = arith.mulf %270, %5 : vector<8x128xf32>
    %272 = arith.addf %268, %271 : vector<8x128xf32>
    %c58 = arith.constant 58 : index
    %273 = memref.load %arg1[%c58] : memref<80xf32, #tpu.memory_space<smem>>
    %274 = vector.broadcast %273 : f32 to vector<8x128xf32>
    %275 = arith.mulf %274, %6 : vector<8x128xf32>
    %276 = arith.addf %272, %275 : vector<8x128xf32>
    %c59 = arith.constant 59 : index
    %277 = memref.load %arg1[%c59] : memref<80xf32, #tpu.memory_space<smem>>
    %278 = vector.broadcast %277 : f32 to vector<8x128xf32>
    %279 = arith.mulf %278, %7 : vector<8x128xf32>
    %280 = arith.addf %276, %279 : vector<8x128xf32>
    %c60 = arith.constant 60 : index
    %281 = memref.load %arg1[%c60] : memref<80xf32, #tpu.memory_space<smem>>
    %282 = vector.broadcast %281 : f32 to vector<8x128xf32>
    %283 = arith.mulf %282, %4 : vector<8x128xf32>
    %284 = arith.addf %280, %283 : vector<8x128xf32>
    %c61 = arith.constant 61 : index
    %285 = memref.load %arg1[%c61] : memref<80xf32, #tpu.memory_space<smem>>
    %286 = vector.broadcast %285 : f32 to vector<8x128xf32>
    %287 = arith.mulf %286, %8 : vector<8x128xf32>
    %288 = arith.addf %284, %287 : vector<8x128xf32>
    %c62 = arith.constant 62 : index
    %289 = memref.load %arg1[%c62] : memref<80xf32, #tpu.memory_space<smem>>
    %290 = vector.broadcast %289 : f32 to vector<8x128xf32>
    %291 = arith.mulf %290, %9 : vector<8x128xf32>
    %292 = arith.addf %288, %291 : vector<8x128xf32>
    %c63 = arith.constant 63 : index
    %293 = memref.load %arg1[%c63] : memref<80xf32, #tpu.memory_space<smem>>
    %294 = vector.broadcast %293 : f32 to vector<8x128xf32>
    %295 = arith.mulf %294, %10 : vector<8x128xf32>
    %296 = arith.addf %292, %295 : vector<8x128xf32>
    %cst_22 = arith.constant 0.000000e+00 : f32
    %297 = vector.broadcast %cst_22 : f32 to vector<8x128xf32>
    %298 = arith.maximumf %296, %297 : vector<8x128xf32>
    %c8_23 = arith.constant 8 : index
    %299 = memref.load %arg2[%c8_23] : memref<10xf32, #tpu.memory_space<smem>>
    %c64 = arith.constant 64 : index
    %300 = memref.load %arg1[%c64] : memref<80xf32, #tpu.memory_space<smem>>
    %301 = vector.broadcast %300 : f32 to vector<8x128xf32>
    %302 = arith.mulf %301, %0 : vector<8x128xf32>
    %303 = vector.broadcast %299 : f32 to vector<8x128xf32>
    %304 = arith.addf %303, %302 : vector<8x128xf32>
    %c65 = arith.constant 65 : index
    %305 = memref.load %arg1[%c65] : memref<80xf32, #tpu.memory_space<smem>>
    %306 = vector.broadcast %305 : f32 to vector<8x128xf32>
    %307 = arith.mulf %306, %5 : vector<8x128xf32>
    %308 = arith.addf %304, %307 : vector<8x128xf32>
    %c66 = arith.constant 66 : index
    %309 = memref.load %arg1[%c66] : memref<80xf32, #tpu.memory_space<smem>>
    %310 = vector.broadcast %309 : f32 to vector<8x128xf32>
    %311 = arith.mulf %310, %6 : vector<8x128xf32>
    %312 = arith.addf %308, %311 : vector<8x128xf32>
    %c67 = arith.constant 67 : index
    %313 = memref.load %arg1[%c67] : memref<80xf32, #tpu.memory_space<smem>>
    %314 = vector.broadcast %313 : f32 to vector<8x128xf32>
    %315 = arith.mulf %314, %7 : vector<8x128xf32>
    %316 = arith.addf %312, %315 : vector<8x128xf32>
    %c68 = arith.constant 68 : index
    %317 = memref.load %arg1[%c68] : memref<80xf32, #tpu.memory_space<smem>>
    %318 = vector.broadcast %317 : f32 to vector<8x128xf32>
    %319 = arith.mulf %318, %4 : vector<8x128xf32>
    %320 = arith.addf %316, %319 : vector<8x128xf32>
    %c69 = arith.constant 69 : index
    %321 = memref.load %arg1[%c69] : memref<80xf32, #tpu.memory_space<smem>>
    %322 = vector.broadcast %321 : f32 to vector<8x128xf32>
    %323 = arith.mulf %322, %8 : vector<8x128xf32>
    %324 = arith.addf %320, %323 : vector<8x128xf32>
    %c70 = arith.constant 70 : index
    %325 = memref.load %arg1[%c70] : memref<80xf32, #tpu.memory_space<smem>>
    %326 = vector.broadcast %325 : f32 to vector<8x128xf32>
    %327 = arith.mulf %326, %9 : vector<8x128xf32>
    %328 = arith.addf %324, %327 : vector<8x128xf32>
    %c71 = arith.constant 71 : index
    %329 = memref.load %arg1[%c71] : memref<80xf32, #tpu.memory_space<smem>>
    %330 = vector.broadcast %329 : f32 to vector<8x128xf32>
    %331 = arith.mulf %330, %10 : vector<8x128xf32>
    %332 = arith.addf %328, %331 : vector<8x128xf32>
    %cst_24 = arith.constant 0.000000e+00 : f32
    %333 = vector.broadcast %cst_24 : f32 to vector<8x128xf32>
    %334 = arith.maximumf %332, %333 : vector<8x128xf32>
    %c9_25 = arith.constant 9 : index
    %335 = memref.load %arg2[%c9_25] : memref<10xf32, #tpu.memory_space<smem>>
    %c72 = arith.constant 72 : index
    %336 = memref.load %arg1[%c72] : memref<80xf32, #tpu.memory_space<smem>>
    %337 = vector.broadcast %336 : f32 to vector<8x128xf32>
    %338 = arith.mulf %337, %0 : vector<8x128xf32>
    %339 = vector.broadcast %335 : f32 to vector<8x128xf32>
    %340 = arith.addf %339, %338 : vector<8x128xf32>
    %c73 = arith.constant 73 : index
    %341 = memref.load %arg1[%c73] : memref<80xf32, #tpu.memory_space<smem>>
    %342 = vector.broadcast %341 : f32 to vector<8x128xf32>
    %343 = arith.mulf %342, %5 : vector<8x128xf32>
    %344 = arith.addf %340, %343 : vector<8x128xf32>
    %c74 = arith.constant 74 : index
    %345 = memref.load %arg1[%c74] : memref<80xf32, #tpu.memory_space<smem>>
    %346 = vector.broadcast %345 : f32 to vector<8x128xf32>
    %347 = arith.mulf %346, %6 : vector<8x128xf32>
    %348 = arith.addf %344, %347 : vector<8x128xf32>
    %c75 = arith.constant 75 : index
    %349 = memref.load %arg1[%c75] : memref<80xf32, #tpu.memory_space<smem>>
    %350 = vector.broadcast %349 : f32 to vector<8x128xf32>
    %351 = arith.mulf %350, %7 : vector<8x128xf32>
    %352 = arith.addf %348, %351 : vector<8x128xf32>
    %c76 = arith.constant 76 : index
    %353 = memref.load %arg1[%c76] : memref<80xf32, #tpu.memory_space<smem>>
    %354 = vector.broadcast %353 : f32 to vector<8x128xf32>
    %355 = arith.mulf %354, %4 : vector<8x128xf32>
    %356 = arith.addf %352, %355 : vector<8x128xf32>
    %c77 = arith.constant 77 : index
    %357 = memref.load %arg1[%c77] : memref<80xf32, #tpu.memory_space<smem>>
    %358 = vector.broadcast %357 : f32 to vector<8x128xf32>
    %359 = arith.mulf %358, %8 : vector<8x128xf32>
    %360 = arith.addf %356, %359 : vector<8x128xf32>
    %c78 = arith.constant 78 : index
    %361 = memref.load %arg1[%c78] : memref<80xf32, #tpu.memory_space<smem>>
    %362 = vector.broadcast %361 : f32 to vector<8x128xf32>
    %363 = arith.mulf %362, %9 : vector<8x128xf32>
    %364 = arith.addf %360, %363 : vector<8x128xf32>
    %c79 = arith.constant 79 : index
    %365 = memref.load %arg1[%c79] : memref<80xf32, #tpu.memory_space<smem>>
    %366 = vector.broadcast %365 : f32 to vector<8x128xf32>
    %367 = arith.mulf %366, %10 : vector<8x128xf32>
    %368 = arith.addf %364, %367 : vector<8x128xf32>
    %cst_26 = arith.constant 0.000000e+00 : f32
    %369 = vector.broadcast %cst_26 : f32 to vector<8x128xf32>
    %370 = arith.maximumf %368, %369 : vector<8x128xf32>
    %c0_27 = arith.constant 0 : index
    %371 = memref.load %arg4[%c0_27] : memref<10xf32, #tpu.memory_space<smem>>
    %c0_28 = arith.constant 0 : index
    %372 = memref.load %arg3[%c0_28] : memref<100xf32, #tpu.memory_space<smem>>
    %373 = vector.broadcast %372 : f32 to vector<8x128xf32>
    %374 = arith.mulf %373, %46 : vector<8x128xf32>
    %375 = vector.broadcast %371 : f32 to vector<8x128xf32>
    %376 = arith.addf %375, %374 : vector<8x128xf32>
    %c1_29 = arith.constant 1 : index
    %377 = memref.load %arg3[%c1_29] : memref<100xf32, #tpu.memory_space<smem>>
    %378 = vector.broadcast %377 : f32 to vector<8x128xf32>
    %379 = arith.mulf %378, %82 : vector<8x128xf32>
    %380 = arith.addf %376, %379 : vector<8x128xf32>
    %c2_30 = arith.constant 2 : index
    %381 = memref.load %arg3[%c2_30] : memref<100xf32, #tpu.memory_space<smem>>
    %382 = vector.broadcast %381 : f32 to vector<8x128xf32>
    %383 = arith.mulf %382, %118 : vector<8x128xf32>
    %384 = arith.addf %380, %383 : vector<8x128xf32>
    %c3_31 = arith.constant 3 : index
    %385 = memref.load %arg3[%c3_31] : memref<100xf32, #tpu.memory_space<smem>>
    %386 = vector.broadcast %385 : f32 to vector<8x128xf32>
    %387 = arith.mulf %386, %154 : vector<8x128xf32>
    %388 = arith.addf %384, %387 : vector<8x128xf32>
    %c4_32 = arith.constant 4 : index
    %389 = memref.load %arg3[%c4_32] : memref<100xf32, #tpu.memory_space<smem>>
    %390 = vector.broadcast %389 : f32 to vector<8x128xf32>
    %391 = arith.mulf %390, %190 : vector<8x128xf32>
    %392 = arith.addf %388, %391 : vector<8x128xf32>
    %c5_33 = arith.constant 5 : index
    %393 = memref.load %arg3[%c5_33] : memref<100xf32, #tpu.memory_space<smem>>
    %394 = vector.broadcast %393 : f32 to vector<8x128xf32>
    %395 = arith.mulf %394, %226 : vector<8x128xf32>
    %396 = arith.addf %392, %395 : vector<8x128xf32>
    %c6_34 = arith.constant 6 : index
    %397 = memref.load %arg3[%c6_34] : memref<100xf32, #tpu.memory_space<smem>>
    %398 = vector.broadcast %397 : f32 to vector<8x128xf32>
    %399 = arith.mulf %398, %262 : vector<8x128xf32>
    %400 = arith.addf %396, %399 : vector<8x128xf32>
    %c7_35 = arith.constant 7 : index
    %401 = memref.load %arg3[%c7_35] : memref<100xf32, #tpu.memory_space<smem>>
    %402 = vector.broadcast %401 : f32 to vector<8x128xf32>
    %403 = arith.mulf %402, %298 : vector<8x128xf32>
    %404 = arith.addf %400, %403 : vector<8x128xf32>
    %c8_36 = arith.constant 8 : index
    %405 = memref.load %arg3[%c8_36] : memref<100xf32, #tpu.memory_space<smem>>
    %406 = vector.broadcast %405 : f32 to vector<8x128xf32>
    %407 = arith.mulf %406, %334 : vector<8x128xf32>
    %408 = arith.addf %404, %407 : vector<8x128xf32>
    %c9_37 = arith.constant 9 : index
    %409 = memref.load %arg3[%c9_37] : memref<100xf32, #tpu.memory_space<smem>>
    %410 = vector.broadcast %409 : f32 to vector<8x128xf32>
    %411 = arith.mulf %410, %370 : vector<8x128xf32>
    %412 = arith.addf %408, %411 : vector<8x128xf32>
    %cst_38 = arith.constant 0.000000e+00 : f32
    %413 = vector.broadcast %cst_38 : f32 to vector<8x128xf32>
    %414 = arith.maximumf %412, %413 : vector<8x128xf32>
    %c1_39 = arith.constant 1 : index
    %415 = memref.load %arg4[%c1_39] : memref<10xf32, #tpu.memory_space<smem>>
    %c10_40 = arith.constant 10 : index
    %416 = memref.load %arg3[%c10_40] : memref<100xf32, #tpu.memory_space<smem>>
    %417 = vector.broadcast %416 : f32 to vector<8x128xf32>
    %418 = arith.mulf %417, %46 : vector<8x128xf32>
    %419 = vector.broadcast %415 : f32 to vector<8x128xf32>
    %420 = arith.addf %419, %418 : vector<8x128xf32>
    %c11_41 = arith.constant 11 : index
    %421 = memref.load %arg3[%c11_41] : memref<100xf32, #tpu.memory_space<smem>>
    %422 = vector.broadcast %421 : f32 to vector<8x128xf32>
    %423 = arith.mulf %422, %82 : vector<8x128xf32>
    %424 = arith.addf %420, %423 : vector<8x128xf32>
    %c12_42 = arith.constant 12 : index
    %425 = memref.load %arg3[%c12_42] : memref<100xf32, #tpu.memory_space<smem>>
    %426 = vector.broadcast %425 : f32 to vector<8x128xf32>
    %427 = arith.mulf %426, %118 : vector<8x128xf32>
    %428 = arith.addf %424, %427 : vector<8x128xf32>
    %c13_43 = arith.constant 13 : index
    %429 = memref.load %arg3[%c13_43] : memref<100xf32, #tpu.memory_space<smem>>
    %430 = vector.broadcast %429 : f32 to vector<8x128xf32>
    %431 = arith.mulf %430, %154 : vector<8x128xf32>
    %432 = arith.addf %428, %431 : vector<8x128xf32>
    %c14_44 = arith.constant 14 : index
    %433 = memref.load %arg3[%c14_44] : memref<100xf32, #tpu.memory_space<smem>>
    %434 = vector.broadcast %433 : f32 to vector<8x128xf32>
    %435 = arith.mulf %434, %190 : vector<8x128xf32>
    %436 = arith.addf %432, %435 : vector<8x128xf32>
    %c15_45 = arith.constant 15 : index
    %437 = memref.load %arg3[%c15_45] : memref<100xf32, #tpu.memory_space<smem>>
    %438 = vector.broadcast %437 : f32 to vector<8x128xf32>
    %439 = arith.mulf %438, %226 : vector<8x128xf32>
    %440 = arith.addf %436, %439 : vector<8x128xf32>
    %c16_46 = arith.constant 16 : index
    %441 = memref.load %arg3[%c16_46] : memref<100xf32, #tpu.memory_space<smem>>
    %442 = vector.broadcast %441 : f32 to vector<8x128xf32>
    %443 = arith.mulf %442, %262 : vector<8x128xf32>
    %444 = arith.addf %440, %443 : vector<8x128xf32>
    %c17_47 = arith.constant 17 : index
    %445 = memref.load %arg3[%c17_47] : memref<100xf32, #tpu.memory_space<smem>>
    %446 = vector.broadcast %445 : f32 to vector<8x128xf32>
    %447 = arith.mulf %446, %298 : vector<8x128xf32>
    %448 = arith.addf %444, %447 : vector<8x128xf32>
    %c18_48 = arith.constant 18 : index
    %449 = memref.load %arg3[%c18_48] : memref<100xf32, #tpu.memory_space<smem>>
    %450 = vector.broadcast %449 : f32 to vector<8x128xf32>
    %451 = arith.mulf %450, %334 : vector<8x128xf32>
    %452 = arith.addf %448, %451 : vector<8x128xf32>
    %c19_49 = arith.constant 19 : index
    %453 = memref.load %arg3[%c19_49] : memref<100xf32, #tpu.memory_space<smem>>
    %454 = vector.broadcast %453 : f32 to vector<8x128xf32>
    %455 = arith.mulf %454, %370 : vector<8x128xf32>
    %456 = arith.addf %452, %455 : vector<8x128xf32>
    %cst_50 = arith.constant 0.000000e+00 : f32
    %457 = vector.broadcast %cst_50 : f32 to vector<8x128xf32>
    %458 = arith.maximumf %456, %457 : vector<8x128xf32>
    %c2_51 = arith.constant 2 : index
    %459 = memref.load %arg4[%c2_51] : memref<10xf32, #tpu.memory_space<smem>>
    %c20_52 = arith.constant 20 : index
    %460 = memref.load %arg3[%c20_52] : memref<100xf32, #tpu.memory_space<smem>>
    %461 = vector.broadcast %460 : f32 to vector<8x128xf32>
    %462 = arith.mulf %461, %46 : vector<8x128xf32>
    %463 = vector.broadcast %459 : f32 to vector<8x128xf32>
    %464 = arith.addf %463, %462 : vector<8x128xf32>
    %c21_53 = arith.constant 21 : index
    %465 = memref.load %arg3[%c21_53] : memref<100xf32, #tpu.memory_space<smem>>
    %466 = vector.broadcast %465 : f32 to vector<8x128xf32>
    %467 = arith.mulf %466, %82 : vector<8x128xf32>
    %468 = arith.addf %464, %467 : vector<8x128xf32>
    %c22_54 = arith.constant 22 : index
    %469 = memref.load %arg3[%c22_54] : memref<100xf32, #tpu.memory_space<smem>>
    %470 = vector.broadcast %469 : f32 to vector<8x128xf32>
    %471 = arith.mulf %470, %118 : vector<8x128xf32>
    %472 = arith.addf %468, %471 : vector<8x128xf32>
    %c23_55 = arith.constant 23 : index
    %473 = memref.load %arg3[%c23_55] : memref<100xf32, #tpu.memory_space<smem>>
    %474 = vector.broadcast %473 : f32 to vector<8x128xf32>
    %475 = arith.mulf %474, %154 : vector<8x128xf32>
    %476 = arith.addf %472, %475 : vector<8x128xf32>
    %c24_56 = arith.constant 24 : index
    %477 = memref.load %arg3[%c24_56] : memref<100xf32, #tpu.memory_space<smem>>
    %478 = vector.broadcast %477 : f32 to vector<8x128xf32>
    %479 = arith.mulf %478, %190 : vector<8x128xf32>
    %480 = arith.addf %476, %479 : vector<8x128xf32>
    %c25_57 = arith.constant 25 : index
    %481 = memref.load %arg3[%c25_57] : memref<100xf32, #tpu.memory_space<smem>>
    %482 = vector.broadcast %481 : f32 to vector<8x128xf32>
    %483 = arith.mulf %482, %226 : vector<8x128xf32>
    %484 = arith.addf %480, %483 : vector<8x128xf32>
    %c26_58 = arith.constant 26 : index
    %485 = memref.load %arg3[%c26_58] : memref<100xf32, #tpu.memory_space<smem>>
    %486 = vector.broadcast %485 : f32 to vector<8x128xf32>
    %487 = arith.mulf %486, %262 : vector<8x128xf32>
    %488 = arith.addf %484, %487 : vector<8x128xf32>
    %c27_59 = arith.constant 27 : index
    %489 = memref.load %arg3[%c27_59] : memref<100xf32, #tpu.memory_space<smem>>
    %490 = vector.broadcast %489 : f32 to vector<8x128xf32>
    %491 = arith.mulf %490, %298 : vector<8x128xf32>
    %492 = arith.addf %488, %491 : vector<8x128xf32>
    %c28_60 = arith.constant 28 : index
    %493 = memref.load %arg3[%c28_60] : memref<100xf32, #tpu.memory_space<smem>>
    %494 = vector.broadcast %493 : f32 to vector<8x128xf32>
    %495 = arith.mulf %494, %334 : vector<8x128xf32>
    %496 = arith.addf %492, %495 : vector<8x128xf32>
    %c29_61 = arith.constant 29 : index
    %497 = memref.load %arg3[%c29_61] : memref<100xf32, #tpu.memory_space<smem>>
    %498 = vector.broadcast %497 : f32 to vector<8x128xf32>
    %499 = arith.mulf %498, %370 : vector<8x128xf32>
    %500 = arith.addf %496, %499 : vector<8x128xf32>
    %cst_62 = arith.constant 0.000000e+00 : f32
    %501 = vector.broadcast %cst_62 : f32 to vector<8x128xf32>
    %502 = arith.maximumf %500, %501 : vector<8x128xf32>
    %c3_63 = arith.constant 3 : index
    %503 = memref.load %arg4[%c3_63] : memref<10xf32, #tpu.memory_space<smem>>
    %c30_64 = arith.constant 30 : index
    %504 = memref.load %arg3[%c30_64] : memref<100xf32, #tpu.memory_space<smem>>
    %505 = vector.broadcast %504 : f32 to vector<8x128xf32>
    %506 = arith.mulf %505, %46 : vector<8x128xf32>
    %507 = vector.broadcast %503 : f32 to vector<8x128xf32>
    %508 = arith.addf %507, %506 : vector<8x128xf32>
    %c31_65 = arith.constant 31 : index
    %509 = memref.load %arg3[%c31_65] : memref<100xf32, #tpu.memory_space<smem>>
    %510 = vector.broadcast %509 : f32 to vector<8x128xf32>
    %511 = arith.mulf %510, %82 : vector<8x128xf32>
    %512 = arith.addf %508, %511 : vector<8x128xf32>
    %c32_66 = arith.constant 32 : index
    %513 = memref.load %arg3[%c32_66] : memref<100xf32, #tpu.memory_space<smem>>
    %514 = vector.broadcast %513 : f32 to vector<8x128xf32>
    %515 = arith.mulf %514, %118 : vector<8x128xf32>
    %516 = arith.addf %512, %515 : vector<8x128xf32>
    %c33_67 = arith.constant 33 : index
    %517 = memref.load %arg3[%c33_67] : memref<100xf32, #tpu.memory_space<smem>>
    %518 = vector.broadcast %517 : f32 to vector<8x128xf32>
    %519 = arith.mulf %518, %154 : vector<8x128xf32>
    %520 = arith.addf %516, %519 : vector<8x128xf32>
    %c34_68 = arith.constant 34 : index
    %521 = memref.load %arg3[%c34_68] : memref<100xf32, #tpu.memory_space<smem>>
    %522 = vector.broadcast %521 : f32 to vector<8x128xf32>
    %523 = arith.mulf %522, %190 : vector<8x128xf32>
    %524 = arith.addf %520, %523 : vector<8x128xf32>
    %c35_69 = arith.constant 35 : index
    %525 = memref.load %arg3[%c35_69] : memref<100xf32, #tpu.memory_space<smem>>
    %526 = vector.broadcast %525 : f32 to vector<8x128xf32>
    %527 = arith.mulf %526, %226 : vector<8x128xf32>
    %528 = arith.addf %524, %527 : vector<8x128xf32>
    %c36_70 = arith.constant 36 : index
    %529 = memref.load %arg3[%c36_70] : memref<100xf32, #tpu.memory_space<smem>>
    %530 = vector.broadcast %529 : f32 to vector<8x128xf32>
    %531 = arith.mulf %530, %262 : vector<8x128xf32>
    %532 = arith.addf %528, %531 : vector<8x128xf32>
    %c37_71 = arith.constant 37 : index
    %533 = memref.load %arg3[%c37_71] : memref<100xf32, #tpu.memory_space<smem>>
    %534 = vector.broadcast %533 : f32 to vector<8x128xf32>
    %535 = arith.mulf %534, %298 : vector<8x128xf32>
    %536 = arith.addf %532, %535 : vector<8x128xf32>
    %c38_72 = arith.constant 38 : index
    %537 = memref.load %arg3[%c38_72] : memref<100xf32, #tpu.memory_space<smem>>
    %538 = vector.broadcast %537 : f32 to vector<8x128xf32>
    %539 = arith.mulf %538, %334 : vector<8x128xf32>
    %540 = arith.addf %536, %539 : vector<8x128xf32>
    %c39_73 = arith.constant 39 : index
    %541 = memref.load %arg3[%c39_73] : memref<100xf32, #tpu.memory_space<smem>>
    %542 = vector.broadcast %541 : f32 to vector<8x128xf32>
    %543 = arith.mulf %542, %370 : vector<8x128xf32>
    %544 = arith.addf %540, %543 : vector<8x128xf32>
    %cst_74 = arith.constant 0.000000e+00 : f32
    %545 = vector.broadcast %cst_74 : f32 to vector<8x128xf32>
    %546 = arith.maximumf %544, %545 : vector<8x128xf32>
    %c4_75 = arith.constant 4 : index
    %547 = memref.load %arg4[%c4_75] : memref<10xf32, #tpu.memory_space<smem>>
    %c40_76 = arith.constant 40 : index
    %548 = memref.load %arg3[%c40_76] : memref<100xf32, #tpu.memory_space<smem>>
    %549 = vector.broadcast %548 : f32 to vector<8x128xf32>
    %550 = arith.mulf %549, %46 : vector<8x128xf32>
    %551 = vector.broadcast %547 : f32 to vector<8x128xf32>
    %552 = arith.addf %551, %550 : vector<8x128xf32>
    %c41_77 = arith.constant 41 : index
    %553 = memref.load %arg3[%c41_77] : memref<100xf32, #tpu.memory_space<smem>>
    %554 = vector.broadcast %553 : f32 to vector<8x128xf32>
    %555 = arith.mulf %554, %82 : vector<8x128xf32>
    %556 = arith.addf %552, %555 : vector<8x128xf32>
    %c42_78 = arith.constant 42 : index
    %557 = memref.load %arg3[%c42_78] : memref<100xf32, #tpu.memory_space<smem>>
    %558 = vector.broadcast %557 : f32 to vector<8x128xf32>
    %559 = arith.mulf %558, %118 : vector<8x128xf32>
    %560 = arith.addf %556, %559 : vector<8x128xf32>
    %c43_79 = arith.constant 43 : index
    %561 = memref.load %arg3[%c43_79] : memref<100xf32, #tpu.memory_space<smem>>
    %562 = vector.broadcast %561 : f32 to vector<8x128xf32>
    %563 = arith.mulf %562, %154 : vector<8x128xf32>
    %564 = arith.addf %560, %563 : vector<8x128xf32>
    %c44_80 = arith.constant 44 : index
    %565 = memref.load %arg3[%c44_80] : memref<100xf32, #tpu.memory_space<smem>>
    %566 = vector.broadcast %565 : f32 to vector<8x128xf32>
    %567 = arith.mulf %566, %190 : vector<8x128xf32>
    %568 = arith.addf %564, %567 : vector<8x128xf32>
    %c45_81 = arith.constant 45 : index
    %569 = memref.load %arg3[%c45_81] : memref<100xf32, #tpu.memory_space<smem>>
    %570 = vector.broadcast %569 : f32 to vector<8x128xf32>
    %571 = arith.mulf %570, %226 : vector<8x128xf32>
    %572 = arith.addf %568, %571 : vector<8x128xf32>
    %c46_82 = arith.constant 46 : index
    %573 = memref.load %arg3[%c46_82] : memref<100xf32, #tpu.memory_space<smem>>
    %574 = vector.broadcast %573 : f32 to vector<8x128xf32>
    %575 = arith.mulf %574, %262 : vector<8x128xf32>
    %576 = arith.addf %572, %575 : vector<8x128xf32>
    %c47_83 = arith.constant 47 : index
    %577 = memref.load %arg3[%c47_83] : memref<100xf32, #tpu.memory_space<smem>>
    %578 = vector.broadcast %577 : f32 to vector<8x128xf32>
    %579 = arith.mulf %578, %298 : vector<8x128xf32>
    %580 = arith.addf %576, %579 : vector<8x128xf32>
    %c48_84 = arith.constant 48 : index
    %581 = memref.load %arg3[%c48_84] : memref<100xf32, #tpu.memory_space<smem>>
    %582 = vector.broadcast %581 : f32 to vector<8x128xf32>
    %583 = arith.mulf %582, %334 : vector<8x128xf32>
    %584 = arith.addf %580, %583 : vector<8x128xf32>
    %c49_85 = arith.constant 49 : index
    %585 = memref.load %arg3[%c49_85] : memref<100xf32, #tpu.memory_space<smem>>
    %586 = vector.broadcast %585 : f32 to vector<8x128xf32>
    %587 = arith.mulf %586, %370 : vector<8x128xf32>
    %588 = arith.addf %584, %587 : vector<8x128xf32>
    %cst_86 = arith.constant 0.000000e+00 : f32
    %589 = vector.broadcast %cst_86 : f32 to vector<8x128xf32>
    %590 = arith.maximumf %588, %589 : vector<8x128xf32>
    %c5_87 = arith.constant 5 : index
    %591 = memref.load %arg4[%c5_87] : memref<10xf32, #tpu.memory_space<smem>>
    %c50_88 = arith.constant 50 : index
    %592 = memref.load %arg3[%c50_88] : memref<100xf32, #tpu.memory_space<smem>>
    %593 = vector.broadcast %592 : f32 to vector<8x128xf32>
    %594 = arith.mulf %593, %46 : vector<8x128xf32>
    %595 = vector.broadcast %591 : f32 to vector<8x128xf32>
    %596 = arith.addf %595, %594 : vector<8x128xf32>
    %c51_89 = arith.constant 51 : index
    %597 = memref.load %arg3[%c51_89] : memref<100xf32, #tpu.memory_space<smem>>
    %598 = vector.broadcast %597 : f32 to vector<8x128xf32>
    %599 = arith.mulf %598, %82 : vector<8x128xf32>
    %600 = arith.addf %596, %599 : vector<8x128xf32>
    %c52_90 = arith.constant 52 : index
    %601 = memref.load %arg3[%c52_90] : memref<100xf32, #tpu.memory_space<smem>>
    %602 = vector.broadcast %601 : f32 to vector<8x128xf32>
    %603 = arith.mulf %602, %118 : vector<8x128xf32>
    %604 = arith.addf %600, %603 : vector<8x128xf32>
    %c53_91 = arith.constant 53 : index
    %605 = memref.load %arg3[%c53_91] : memref<100xf32, #tpu.memory_space<smem>>
    %606 = vector.broadcast %605 : f32 to vector<8x128xf32>
    %607 = arith.mulf %606, %154 : vector<8x128xf32>
    %608 = arith.addf %604, %607 : vector<8x128xf32>
    %c54_92 = arith.constant 54 : index
    %609 = memref.load %arg3[%c54_92] : memref<100xf32, #tpu.memory_space<smem>>
    %610 = vector.broadcast %609 : f32 to vector<8x128xf32>
    %611 = arith.mulf %610, %190 : vector<8x128xf32>
    %612 = arith.addf %608, %611 : vector<8x128xf32>
    %c55_93 = arith.constant 55 : index
    %613 = memref.load %arg3[%c55_93] : memref<100xf32, #tpu.memory_space<smem>>
    %614 = vector.broadcast %613 : f32 to vector<8x128xf32>
    %615 = arith.mulf %614, %226 : vector<8x128xf32>
    %616 = arith.addf %612, %615 : vector<8x128xf32>
    %c56_94 = arith.constant 56 : index
    %617 = memref.load %arg3[%c56_94] : memref<100xf32, #tpu.memory_space<smem>>
    %618 = vector.broadcast %617 : f32 to vector<8x128xf32>
    %619 = arith.mulf %618, %262 : vector<8x128xf32>
    %620 = arith.addf %616, %619 : vector<8x128xf32>
    %c57_95 = arith.constant 57 : index
    %621 = memref.load %arg3[%c57_95] : memref<100xf32, #tpu.memory_space<smem>>
    %622 = vector.broadcast %621 : f32 to vector<8x128xf32>
    %623 = arith.mulf %622, %298 : vector<8x128xf32>
    %624 = arith.addf %620, %623 : vector<8x128xf32>
    %c58_96 = arith.constant 58 : index
    %625 = memref.load %arg3[%c58_96] : memref<100xf32, #tpu.memory_space<smem>>
    %626 = vector.broadcast %625 : f32 to vector<8x128xf32>
    %627 = arith.mulf %626, %334 : vector<8x128xf32>
    %628 = arith.addf %624, %627 : vector<8x128xf32>
    %c59_97 = arith.constant 59 : index
    %629 = memref.load %arg3[%c59_97] : memref<100xf32, #tpu.memory_space<smem>>
    %630 = vector.broadcast %629 : f32 to vector<8x128xf32>
    %631 = arith.mulf %630, %370 : vector<8x128xf32>
    %632 = arith.addf %628, %631 : vector<8x128xf32>
    %cst_98 = arith.constant 0.000000e+00 : f32
    %633 = vector.broadcast %cst_98 : f32 to vector<8x128xf32>
    %634 = arith.maximumf %632, %633 : vector<8x128xf32>
    %c6_99 = arith.constant 6 : index
    %635 = memref.load %arg4[%c6_99] : memref<10xf32, #tpu.memory_space<smem>>
    %c60_100 = arith.constant 60 : index
    %636 = memref.load %arg3[%c60_100] : memref<100xf32, #tpu.memory_space<smem>>
    %637 = vector.broadcast %636 : f32 to vector<8x128xf32>
    %638 = arith.mulf %637, %46 : vector<8x128xf32>
    %639 = vector.broadcast %635 : f32 to vector<8x128xf32>
    %640 = arith.addf %639, %638 : vector<8x128xf32>
    %c61_101 = arith.constant 61 : index
    %641 = memref.load %arg3[%c61_101] : memref<100xf32, #tpu.memory_space<smem>>
    %642 = vector.broadcast %641 : f32 to vector<8x128xf32>
    %643 = arith.mulf %642, %82 : vector<8x128xf32>
    %644 = arith.addf %640, %643 : vector<8x128xf32>
    %c62_102 = arith.constant 62 : index
    %645 = memref.load %arg3[%c62_102] : memref<100xf32, #tpu.memory_space<smem>>
    %646 = vector.broadcast %645 : f32 to vector<8x128xf32>
    %647 = arith.mulf %646, %118 : vector<8x128xf32>
    %648 = arith.addf %644, %647 : vector<8x128xf32>
    %c63_103 = arith.constant 63 : index
    %649 = memref.load %arg3[%c63_103] : memref<100xf32, #tpu.memory_space<smem>>
    %650 = vector.broadcast %649 : f32 to vector<8x128xf32>
    %651 = arith.mulf %650, %154 : vector<8x128xf32>
    %652 = arith.addf %648, %651 : vector<8x128xf32>
    %c64_104 = arith.constant 64 : index
    %653 = memref.load %arg3[%c64_104] : memref<100xf32, #tpu.memory_space<smem>>
    %654 = vector.broadcast %653 : f32 to vector<8x128xf32>
    %655 = arith.mulf %654, %190 : vector<8x128xf32>
    %656 = arith.addf %652, %655 : vector<8x128xf32>
    %c65_105 = arith.constant 65 : index
    %657 = memref.load %arg3[%c65_105] : memref<100xf32, #tpu.memory_space<smem>>
    %658 = vector.broadcast %657 : f32 to vector<8x128xf32>
    %659 = arith.mulf %658, %226 : vector<8x128xf32>
    %660 = arith.addf %656, %659 : vector<8x128xf32>
    %c66_106 = arith.constant 66 : index
    %661 = memref.load %arg3[%c66_106] : memref<100xf32, #tpu.memory_space<smem>>
    %662 = vector.broadcast %661 : f32 to vector<8x128xf32>
    %663 = arith.mulf %662, %262 : vector<8x128xf32>
    %664 = arith.addf %660, %663 : vector<8x128xf32>
    %c67_107 = arith.constant 67 : index
    %665 = memref.load %arg3[%c67_107] : memref<100xf32, #tpu.memory_space<smem>>
    %666 = vector.broadcast %665 : f32 to vector<8x128xf32>
    %667 = arith.mulf %666, %298 : vector<8x128xf32>
    %668 = arith.addf %664, %667 : vector<8x128xf32>
    %c68_108 = arith.constant 68 : index
    %669 = memref.load %arg3[%c68_108] : memref<100xf32, #tpu.memory_space<smem>>
    %670 = vector.broadcast %669 : f32 to vector<8x128xf32>
    %671 = arith.mulf %670, %334 : vector<8x128xf32>
    %672 = arith.addf %668, %671 : vector<8x128xf32>
    %c69_109 = arith.constant 69 : index
    %673 = memref.load %arg3[%c69_109] : memref<100xf32, #tpu.memory_space<smem>>
    %674 = vector.broadcast %673 : f32 to vector<8x128xf32>
    %675 = arith.mulf %674, %370 : vector<8x128xf32>
    %676 = arith.addf %672, %675 : vector<8x128xf32>
    %cst_110 = arith.constant 0.000000e+00 : f32
    %677 = vector.broadcast %cst_110 : f32 to vector<8x128xf32>
    %678 = arith.maximumf %676, %677 : vector<8x128xf32>
    %c7_111 = arith.constant 7 : index
    %679 = memref.load %arg4[%c7_111] : memref<10xf32, #tpu.memory_space<smem>>
    %c70_112 = arith.constant 70 : index
    %680 = memref.load %arg3[%c70_112] : memref<100xf32, #tpu.memory_space<smem>>
    %681 = vector.broadcast %680 : f32 to vector<8x128xf32>
    %682 = arith.mulf %681, %46 : vector<8x128xf32>
    %683 = vector.broadcast %679 : f32 to vector<8x128xf32>
    %684 = arith.addf %683, %682 : vector<8x128xf32>
    %c71_113 = arith.constant 71 : index
    %685 = memref.load %arg3[%c71_113] : memref<100xf32, #tpu.memory_space<smem>>
    %686 = vector.broadcast %685 : f32 to vector<8x128xf32>
    %687 = arith.mulf %686, %82 : vector<8x128xf32>
    %688 = arith.addf %684, %687 : vector<8x128xf32>
    %c72_114 = arith.constant 72 : index
    %689 = memref.load %arg3[%c72_114] : memref<100xf32, #tpu.memory_space<smem>>
    %690 = vector.broadcast %689 : f32 to vector<8x128xf32>
    %691 = arith.mulf %690, %118 : vector<8x128xf32>
    %692 = arith.addf %688, %691 : vector<8x128xf32>
    %c73_115 = arith.constant 73 : index
    %693 = memref.load %arg3[%c73_115] : memref<100xf32, #tpu.memory_space<smem>>
    %694 = vector.broadcast %693 : f32 to vector<8x128xf32>
    %695 = arith.mulf %694, %154 : vector<8x128xf32>
    %696 = arith.addf %692, %695 : vector<8x128xf32>
    %c74_116 = arith.constant 74 : index
    %697 = memref.load %arg3[%c74_116] : memref<100xf32, #tpu.memory_space<smem>>
    %698 = vector.broadcast %697 : f32 to vector<8x128xf32>
    %699 = arith.mulf %698, %190 : vector<8x128xf32>
    %700 = arith.addf %696, %699 : vector<8x128xf32>
    %c75_117 = arith.constant 75 : index
    %701 = memref.load %arg3[%c75_117] : memref<100xf32, #tpu.memory_space<smem>>
    %702 = vector.broadcast %701 : f32 to vector<8x128xf32>
    %703 = arith.mulf %702, %226 : vector<8x128xf32>
    %704 = arith.addf %700, %703 : vector<8x128xf32>
    %c76_118 = arith.constant 76 : index
    %705 = memref.load %arg3[%c76_118] : memref<100xf32, #tpu.memory_space<smem>>
    %706 = vector.broadcast %705 : f32 to vector<8x128xf32>
    %707 = arith.mulf %706, %262 : vector<8x128xf32>
    %708 = arith.addf %704, %707 : vector<8x128xf32>
    %c77_119 = arith.constant 77 : index
    %709 = memref.load %arg3[%c77_119] : memref<100xf32, #tpu.memory_space<smem>>
    %710 = vector.broadcast %709 : f32 to vector<8x128xf32>
    %711 = arith.mulf %710, %298 : vector<8x128xf32>
    %712 = arith.addf %708, %711 : vector<8x128xf32>
    %c78_120 = arith.constant 78 : index
    %713 = memref.load %arg3[%c78_120] : memref<100xf32, #tpu.memory_space<smem>>
    %714 = vector.broadcast %713 : f32 to vector<8x128xf32>
    %715 = arith.mulf %714, %334 : vector<8x128xf32>
    %716 = arith.addf %712, %715 : vector<8x128xf32>
    %c79_121 = arith.constant 79 : index
    %717 = memref.load %arg3[%c79_121] : memref<100xf32, #tpu.memory_space<smem>>
    %718 = vector.broadcast %717 : f32 to vector<8x128xf32>
    %719 = arith.mulf %718, %370 : vector<8x128xf32>
    %720 = arith.addf %716, %719 : vector<8x128xf32>
    %cst_122 = arith.constant 0.000000e+00 : f32
    %721 = vector.broadcast %cst_122 : f32 to vector<8x128xf32>
    %722 = arith.maximumf %720, %721 : vector<8x128xf32>
    %c8_123 = arith.constant 8 : index
    %723 = memref.load %arg4[%c8_123] : memref<10xf32, #tpu.memory_space<smem>>
    %c80 = arith.constant 80 : index
    %724 = memref.load %arg3[%c80] : memref<100xf32, #tpu.memory_space<smem>>
    %725 = vector.broadcast %724 : f32 to vector<8x128xf32>
    %726 = arith.mulf %725, %46 : vector<8x128xf32>
    %727 = vector.broadcast %723 : f32 to vector<8x128xf32>
    %728 = arith.addf %727, %726 : vector<8x128xf32>
    %c81 = arith.constant 81 : index
    %729 = memref.load %arg3[%c81] : memref<100xf32, #tpu.memory_space<smem>>
    %730 = vector.broadcast %729 : f32 to vector<8x128xf32>
    %731 = arith.mulf %730, %82 : vector<8x128xf32>
    %732 = arith.addf %728, %731 : vector<8x128xf32>
    %c82 = arith.constant 82 : index
    %733 = memref.load %arg3[%c82] : memref<100xf32, #tpu.memory_space<smem>>
    %734 = vector.broadcast %733 : f32 to vector<8x128xf32>
    %735 = arith.mulf %734, %118 : vector<8x128xf32>
    %736 = arith.addf %732, %735 : vector<8x128xf32>
    %c83 = arith.constant 83 : index
    %737 = memref.load %arg3[%c83] : memref<100xf32, #tpu.memory_space<smem>>
    %738 = vector.broadcast %737 : f32 to vector<8x128xf32>
    %739 = arith.mulf %738, %154 : vector<8x128xf32>
    %740 = arith.addf %736, %739 : vector<8x128xf32>
    %c84 = arith.constant 84 : index
    %741 = memref.load %arg3[%c84] : memref<100xf32, #tpu.memory_space<smem>>
    %742 = vector.broadcast %741 : f32 to vector<8x128xf32>
    %743 = arith.mulf %742, %190 : vector<8x128xf32>
    %744 = arith.addf %740, %743 : vector<8x128xf32>
    %c85 = arith.constant 85 : index
    %745 = memref.load %arg3[%c85] : memref<100xf32, #tpu.memory_space<smem>>
    %746 = vector.broadcast %745 : f32 to vector<8x128xf32>
    %747 = arith.mulf %746, %226 : vector<8x128xf32>
    %748 = arith.addf %744, %747 : vector<8x128xf32>
    %c86 = arith.constant 86 : index
    %749 = memref.load %arg3[%c86] : memref<100xf32, #tpu.memory_space<smem>>
    %750 = vector.broadcast %749 : f32 to vector<8x128xf32>
    %751 = arith.mulf %750, %262 : vector<8x128xf32>
    %752 = arith.addf %748, %751 : vector<8x128xf32>
    %c87 = arith.constant 87 : index
    %753 = memref.load %arg3[%c87] : memref<100xf32, #tpu.memory_space<smem>>
    %754 = vector.broadcast %753 : f32 to vector<8x128xf32>
    %755 = arith.mulf %754, %298 : vector<8x128xf32>
    %756 = arith.addf %752, %755 : vector<8x128xf32>
    %c88 = arith.constant 88 : index
    %757 = memref.load %arg3[%c88] : memref<100xf32, #tpu.memory_space<smem>>
    %758 = vector.broadcast %757 : f32 to vector<8x128xf32>
    %759 = arith.mulf %758, %334 : vector<8x128xf32>
    %760 = arith.addf %756, %759 : vector<8x128xf32>
    %c89 = arith.constant 89 : index
    %761 = memref.load %arg3[%c89] : memref<100xf32, #tpu.memory_space<smem>>
    %762 = vector.broadcast %761 : f32 to vector<8x128xf32>
    %763 = arith.mulf %762, %370 : vector<8x128xf32>
    %764 = arith.addf %760, %763 : vector<8x128xf32>
    %cst_124 = arith.constant 0.000000e+00 : f32
    %765 = vector.broadcast %cst_124 : f32 to vector<8x128xf32>
    %766 = arith.maximumf %764, %765 : vector<8x128xf32>
    %c9_125 = arith.constant 9 : index
    %767 = memref.load %arg4[%c9_125] : memref<10xf32, #tpu.memory_space<smem>>
    %c90 = arith.constant 90 : index
    %768 = memref.load %arg3[%c90] : memref<100xf32, #tpu.memory_space<smem>>
    %769 = vector.broadcast %768 : f32 to vector<8x128xf32>
    %770 = arith.mulf %769, %46 : vector<8x128xf32>
    %771 = vector.broadcast %767 : f32 to vector<8x128xf32>
    %772 = arith.addf %771, %770 : vector<8x128xf32>
    %c91 = arith.constant 91 : index
    %773 = memref.load %arg3[%c91] : memref<100xf32, #tpu.memory_space<smem>>
    %774 = vector.broadcast %773 : f32 to vector<8x128xf32>
    %775 = arith.mulf %774, %82 : vector<8x128xf32>
    %776 = arith.addf %772, %775 : vector<8x128xf32>
    %c92 = arith.constant 92 : index
    %777 = memref.load %arg3[%c92] : memref<100xf32, #tpu.memory_space<smem>>
    %778 = vector.broadcast %777 : f32 to vector<8x128xf32>
    %779 = arith.mulf %778, %118 : vector<8x128xf32>
    %780 = arith.addf %776, %779 : vector<8x128xf32>
    %c93 = arith.constant 93 : index
    %781 = memref.load %arg3[%c93] : memref<100xf32, #tpu.memory_space<smem>>
    %782 = vector.broadcast %781 : f32 to vector<8x128xf32>
    %783 = arith.mulf %782, %154 : vector<8x128xf32>
    %784 = arith.addf %780, %783 : vector<8x128xf32>
    %c94 = arith.constant 94 : index
    %785 = memref.load %arg3[%c94] : memref<100xf32, #tpu.memory_space<smem>>
    %786 = vector.broadcast %785 : f32 to vector<8x128xf32>
    %787 = arith.mulf %786, %190 : vector<8x128xf32>
    %788 = arith.addf %784, %787 : vector<8x128xf32>
    %c95 = arith.constant 95 : index
    %789 = memref.load %arg3[%c95] : memref<100xf32, #tpu.memory_space<smem>>
    %790 = vector.broadcast %789 : f32 to vector<8x128xf32>
    %791 = arith.mulf %790, %226 : vector<8x128xf32>
    %792 = arith.addf %788, %791 : vector<8x128xf32>
    %c96 = arith.constant 96 : index
    %793 = memref.load %arg3[%c96] : memref<100xf32, #tpu.memory_space<smem>>
    %794 = vector.broadcast %793 : f32 to vector<8x128xf32>
    %795 = arith.mulf %794, %262 : vector<8x128xf32>
    %796 = arith.addf %792, %795 : vector<8x128xf32>
    %c97 = arith.constant 97 : index
    %797 = memref.load %arg3[%c97] : memref<100xf32, #tpu.memory_space<smem>>
    %798 = vector.broadcast %797 : f32 to vector<8x128xf32>
    %799 = arith.mulf %798, %298 : vector<8x128xf32>
    %800 = arith.addf %796, %799 : vector<8x128xf32>
    %c98 = arith.constant 98 : index
    %801 = memref.load %arg3[%c98] : memref<100xf32, #tpu.memory_space<smem>>
    %802 = vector.broadcast %801 : f32 to vector<8x128xf32>
    %803 = arith.mulf %802, %334 : vector<8x128xf32>
    %804 = arith.addf %800, %803 : vector<8x128xf32>
    %c99 = arith.constant 99 : index
    %805 = memref.load %arg3[%c99] : memref<100xf32, #tpu.memory_space<smem>>
    %806 = vector.broadcast %805 : f32 to vector<8x128xf32>
    %807 = arith.mulf %806, %370 : vector<8x128xf32>
    %808 = arith.addf %804, %807 : vector<8x128xf32>
    %cst_126 = arith.constant 0.000000e+00 : f32
    %809 = vector.broadcast %cst_126 : f32 to vector<8x128xf32>
    %810 = arith.maximumf %808, %809 : vector<8x128xf32>
    %c0_127 = arith.constant 0 : index
    %811 = memref.load %arg6[%c0_127] : memref<1xf32, #tpu.memory_space<smem>>
    %c0_128 = arith.constant 0 : index
    %812 = memref.load %arg5[%c0_128] : memref<10xf32, #tpu.memory_space<smem>>
    %813 = vector.broadcast %812 : f32 to vector<8x128xf32>
    %814 = arith.mulf %813, %414 : vector<8x128xf32>
    %815 = vector.broadcast %811 : f32 to vector<8x128xf32>
    %816 = arith.addf %815, %814 : vector<8x128xf32>
    %c1_129 = arith.constant 1 : index
    %817 = memref.load %arg5[%c1_129] : memref<10xf32, #tpu.memory_space<smem>>
    %818 = vector.broadcast %817 : f32 to vector<8x128xf32>
    %819 = arith.mulf %818, %458 : vector<8x128xf32>
    %820 = arith.addf %816, %819 : vector<8x128xf32>
    %c2_130 = arith.constant 2 : index
    %821 = memref.load %arg5[%c2_130] : memref<10xf32, #tpu.memory_space<smem>>
    %822 = vector.broadcast %821 : f32 to vector<8x128xf32>
    %823 = arith.mulf %822, %502 : vector<8x128xf32>
    %824 = arith.addf %820, %823 : vector<8x128xf32>
    %c3_131 = arith.constant 3 : index
    %825 = memref.load %arg5[%c3_131] : memref<10xf32, #tpu.memory_space<smem>>
    %826 = vector.broadcast %825 : f32 to vector<8x128xf32>
    %827 = arith.mulf %826, %546 : vector<8x128xf32>
    %828 = arith.addf %824, %827 : vector<8x128xf32>
    %c4_132 = arith.constant 4 : index
    %829 = memref.load %arg5[%c4_132] : memref<10xf32, #tpu.memory_space<smem>>
    %830 = vector.broadcast %829 : f32 to vector<8x128xf32>
    %831 = arith.mulf %830, %590 : vector<8x128xf32>
    %832 = arith.addf %828, %831 : vector<8x128xf32>
    %c5_133 = arith.constant 5 : index
    %833 = memref.load %arg5[%c5_133] : memref<10xf32, #tpu.memory_space<smem>>
    %834 = vector.broadcast %833 : f32 to vector<8x128xf32>
    %835 = arith.mulf %834, %634 : vector<8x128xf32>
    %836 = arith.addf %832, %835 : vector<8x128xf32>
    %c6_134 = arith.constant 6 : index
    %837 = memref.load %arg5[%c6_134] : memref<10xf32, #tpu.memory_space<smem>>
    %838 = vector.broadcast %837 : f32 to vector<8x128xf32>
    %839 = arith.mulf %838, %678 : vector<8x128xf32>
    %840 = arith.addf %836, %839 : vector<8x128xf32>
    %c7_135 = arith.constant 7 : index
    %841 = memref.load %arg5[%c7_135] : memref<10xf32, #tpu.memory_space<smem>>
    %842 = vector.broadcast %841 : f32 to vector<8x128xf32>
    %843 = arith.mulf %842, %722 : vector<8x128xf32>
    %844 = arith.addf %840, %843 : vector<8x128xf32>
    %c8_136 = arith.constant 8 : index
    %845 = memref.load %arg5[%c8_136] : memref<10xf32, #tpu.memory_space<smem>>
    %846 = vector.broadcast %845 : f32 to vector<8x128xf32>
    %847 = arith.mulf %846, %766 : vector<8x128xf32>
    %848 = arith.addf %844, %847 : vector<8x128xf32>
    %c9_137 = arith.constant 9 : index
    %849 = memref.load %arg5[%c9_137] : memref<10xf32, #tpu.memory_space<smem>>
    %850 = vector.broadcast %849 : f32 to vector<8x128xf32>
    %851 = arith.mulf %850, %810 : vector<8x128xf32>
    %852 = arith.addf %848, %851 : vector<8x128xf32>
    %cst_138 = arith.constant 0.000000e+00 : f32
    %cst_139 = arith.constant 5.000000e-01 : f32
    %853 = vector.broadcast %cst_138 : f32 to vector<8x128xf32>
    %854 = arith.maximumf %853, %852 : vector<8x128xf32>
    %855 = vector.broadcast %cst_139 : f32 to vector<8x128xf32>
    %856 = arith.minimumf %855, %854 : vector<8x128xf32>
    %857 = tpu.iota {dimensions = array<i32: 1>} : vector<8x128xi32>
    %c0_i32 = arith.constant 0 : i32
    %858 = vector.broadcast %c0_i32 : i32 to vector<8x128xi32>
    %859 = arith.cmpi eq, %857, %858 : vector<8x128xi32>
    %c1_i32 = arith.constant 1 : i32
    %860 = tpu.dynamic_rotate %856 by %c1_i32 dim 1 : vector<8x128xf32>, i32 -> vector<8x128xf32>
    %861 = arith.subf %856, %860 : vector<8x128xf32>
    %cst_140 = arith.constant 0.000000e+00 : f32
    %862 = vector.broadcast %cst_140 : f32 to vector<8x128xf32>
    %863 = arith.select %859, %862, %861 : vector<8x128xi1>, vector<8x128xf32>
    %cst_141 = arith.constant 1.000000e+00 : f32
    %864 = vector.broadcast %cst_141 : f32 to vector<8x128xf32>
    %865 = arith.mulf %864, %863 : vector<8x128xf32>
    %866 = arith.subf %5, %865 : vector<8x128xf32>
    %c0_142 = arith.constant 0 : index
    %c0_143 = arith.constant 0 : index
    %867 = vector.load %arg9[%c0_142, %c0_143] : memref<8x128xf32, #tpu.memory_space<vmem>>, vector<8x128xf32>
    tpu.vector_store %arg9[%c0_142, %c0_143], %866 {strides = array<i32>} : memref<8x128xf32, #tpu.memory_space<vmem>>, vector<8x128xf32>,
    %c0_144 = arith.constant 0 : index
    %c0_145 = arith.constant 0 : index
    %868 = vector.load %arg10[%c0_144, %c0_145] : memref<8x128xf32, #tpu.memory_space<vmem>>, vector<8x128xf32>
    tpu.vector_store %arg10[%c0_144, %c0_145], %856 {strides = array<i32>} : memref<8x128xf32, #tpu.memory_space<vmem>>, vector<8x128xf32>,
    return
  }
  func.func @transform_0(%arg0: i32) -> i32 {
    %c0_i32 = arith.constant 0 : i32
    %c0_i32_0 = arith.constant 0 : i32
    return %c0_i32 : i32
  }
  func.func @transform_1(%arg0: i32) -> i32 {
    %c0_i32 = arith.constant 0 : i32
    %c0_i32_0 = arith.constant 0 : i32
    return %c0_i32 : i32
  }
  func.func @transform_2(%arg0: i32) -> i32 {
    %c0_i32 = arith.constant 0 : i32
    %c0_i32_0 = arith.constant 0 : i32
    return %c0_i32 : i32
  }
  func.func @transform_3(%arg0: i32) -> i32 {
    %c0_i32 = arith.constant 0 : i32
    %c0_i32_0 = arith.constant 0 : i32
    return %c0_i32 : i32
  }
  func.func @transform_4(%arg0: i32) -> i32 {
    %c0_i32 = arith.constant 0 : i32
    %c0_i32_0 = arith.constant 0 : i32
    return %c0_i32 : i32
  }
  func.func @transform_5(%arg0: i32) -> i32 {
    %c0_i32 = arith.constant 0 : i32
    %c0_i32_0 = arith.constant 0 : i32
    return %c0_i32 : i32
  }
  func.func @transform_6(%arg0: i32) -> (i32, i32) {
    %c0_i32 = arith.constant 0 : i32
    %c0_i32_0 = arith.constant 0 : i32
    return %arg0, %c0_i32 : i32, i32
  }
  func.func @transform_7(%arg0: i32) -> (i32, i32) {
    %c0_i32 = arith.constant 0 : i32
    %c0_i32_0 = arith.constant 0 : i32
    return %arg0, %c0_i32 : i32, i32
  }
  func.func @transform_8(%arg0: i32) -> (i32, i32) {
    %c0_i32 = arith.constant 0 : i32
    %c0_i32_0 = arith.constant 0 : i32
    return %arg0, %c0_i32 : i32, i32
  }
  func.func @transform_9(%arg0: i32) -> (i32, i32) {
    %c0_i32 = arith.constant 0 : i32
    %c0_i32_0 = arith.constant 0 : i32
    return %arg0, %c0_i32 : i32, i32
  }
}

</mosaic_0001>

<bundles_post_ra>
// kernel: tpu_custom_call.1
= control target key start
LH: loop header
LB: loop body
LE: loop exit
PB: predicated region body
PF: predicated region fallthrough
CT: control target
= control target key end

     0   :  { %s2550_s0 = inlined_call_operand.vmem [shape: f32[80], index: 0, kind: input, shape index: {}]   ;;  %s2551_s1 = inlined_call_operand.vmem [shape: f32[10], index: 1, kind: input, shape index: {}]   ;;  %s2552_s2 = inlined_call_operand.vmem [shape: f32[100], index: 2, kind: input, shape index: {}]   ;;  %s2553_s3 = inlined_call_operand.vmem [shape: f32[10], index: 3, kind: input, shape index: {}]   ;;  %s2554_s4 = inlined_call_operand.vmem [shape: f32[10], index: 4, kind: input, shape index: {}]   ;;  %s2555_s5 = inlined_call_operand.<no memory space> [shape: f32[1], index: 5, kind: input, shape index: {}]   ;;  %s2556_s6 = inlined_call_operand.hbm [shape: f32[8,128], index: 6, kind: input, shape index: {}]   ;;  %s2557_s7 = inlined_call_operand.hbm [shape: f32[8,128], index: 7, kind: input, shape index: {}]   ;;  %s2558_s8 = inlined_call_operand.hbm [shape: f32[8,128], index: 8, kind: output, shape index: {0}]   ;;  %s2559_s9 = inlined_call_operand.hbm [shape: f32[8,128], index: 9, kind: output, shape index: {1}]  }
   0x1   :  { %2597 = sst [smem:[#allocation81_spill]] %s2555_s5 }
   0x2   :  { %2598 = sst [smem:[#allocation82_spill]] %s2558_s8 }
   0x3   :  { %2599 = sst [smem:[#allocation83_spill]] %s2559_s9 }
   0x4   :  { %16 = vsyncpa [#allocation6], 0 }
   0x5   :  { %17 = vsyncpa [#allocation8], 0 }
   0x6   :  { %18 = vsyncpa [#allocation11], 0 }
   0x7   :  { %19 = vsyncpa [#allocation4], 0 }
   0x8   :  { %20 = vsyncpa [#allocation15], 0 }
   0x9   :  { %21 = vsyncpa [#allocation5], 0  ;;  %s37_s11 = sshll.u32 %s2551_s1, 4  ;;  %s38_s11 = int_to_ptr.vmem [resolvable:$true] %s37_s11 }
   0xa   :  { %22 = vsyncpa [#allocation18], 0  ;;  %s55_s14 = sshll.u32 %s2553_s3, 4  ;;  %s1398_s15 = smov [#allocation7]   ;;  %s56_s14 = int_to_ptr.vmem [resolvable:$true] %s55_s14 }
   0xb   :  { %40 = dma.vmem_to_smem %s38_s11, 16, %s1398_s15, [#allocation8]  }
   0xc   :  { %s1399_s16 = smov [#allocation10]   ;;  %s28_s19 = sshll.u32 %s2550_s0, 4  ;;  %s29_s19 = int_to_ptr.vmem [resolvable:$true] %s28_s19 }
   0xd   :  { %58 = dma.vmem_to_smem %s56_s14, 16, %s1399_s16, [#allocation11]  }
   0xe   :  { %s46_s1 = sshll.u32 %s2552_s2, 4  ;;  %s1400_s22 = smov [#allocation3]   ;;  %s47_s1 = int_to_ptr.vmem [resolvable:$true] %s46_s1 }
   0xf   :  { %31 = dma.vmem_to_smem %s29_s19, 16, %s1400_s22, [#allocation6]  }
  0x10   :  { %s1401_s23 = smov [#allocation9]   ;;  %s64_s25 = sshll.u32 %s2554_s4, 4  ;;  %s65_s25 = int_to_ptr.vmem [resolvable:$true] %s64_s25 }
  0x11   :  { %49 = dma.vmem_to_smem %s47_s1, 16, %s1401_s23, [#allocation8]  }
  0x12   :  { %s75_s28 = sshll.u32 %s2556_s6, 4  ;;  %s1402_s0 = smov [#allocation12]   ;;  %s76_s28 = int_to_ptr.hbm [resolvable:$true] %s75_s28 }
  0x13   :  { %67 = dma.vmem_to_smem %s65_s25, 16, %s1402_s0, [#allocation11]  }
  0x14   :  { %s1403_s29 = smov [#allocation13]   ;;  %s86_s11 = sshll.u32 %s2557_s7, 4  ;;  %s87_s11 = int_to_ptr.hbm [resolvable:$true] %s86_s11 }
  0x15   :  { %s77_s30 = sshll.u32 %s1403_s29, 4  ;;  %s1404_s12 = smov [#allocation14]   ;;  %s78_s30 = int_to_ptr.vmem [resolvable:$true] %s77_s30 }
  0x16   :  { %80 = dma.hbm_to_vmem [thread:$0]  %s76_s28, 128, %s78_s30, [#allocation4]  }
  0x17   :  { %s88_s13 = sshll.u32 %s1404_s12, 4  ;;  %s89_s13 = int_to_ptr.vmem [resolvable:$true] %s88_s13 }
  0x18   :  { %91 = dma.hbm_to_vmem [thread:$0]  %s87_s11, 128, %s89_s13, [#allocation15]  }
  0x19   :  { %1384 = dma.done.wait [#allocation6], 16  }
  0x1a   :  { %1385 = vsyncadd [#allocation6], 4294967280 }
  0x1b   :  { %1386 = dma.done.wait [#allocation8], 32  }
  0x1c   :  { %1387 = vsyncadd [#allocation8], 4294967264 }
  0x1d   :  { %1388 = dma.done.wait [#allocation11], 32  }
  0x1e   :  { %1389 = vsyncadd [#allocation11], 4294967264 }
  0x1f   :  { %1390 = dma.done.wait [#allocation4], 128  }
  0x20   :  { %1391 = vsyncadd [#allocation4], 4294967168 }
  0x21   :  { %1392 = dma.done.wait [#allocation15], 128  }
  0x22   :  { %1393 = vsyncadd [#allocation15], 4294967168 }
  0x23   :  { %120 = sfence }
  0x24   :  { %v1482_v0 = vld [vmem:[#allocation13] sm:$0xff]  ;;  %v122_v1 = vld [vmem:[#allocation14] sm:$0xff]  ;;  %s1405_s4 = smov 127   ;;  %s1406_s6 = smov 125  }
  0x25   :  { %125 = vrot.lane.b32.xlu0 %v1482_v0, %s1405_s4  ;;  %129 = vrot.lane.b32.xlu1 %v1482_v0, %s1406_s6  ;;  %v123_v2 = vmul.f32 100.0, %v122_v1  ;;  %s1407_s7 = smov 126   ;;  %s1492_s14 = sld [smem:[#allocation3 + $0x1]] }
  0x26   :  { %s1494_s15 = sld [smem:[#allocation3 + $0x9]] }
  0x27   :  { %1226 = vtanh.f32 %v123_v2  ;;  %s1496_s16 = sld [smem:[#allocation3 + $0x11]] }
  0x28   :  { %s1498_s17 = sld [smem:[#allocation3 + $0x19]] }
  0x29   :  { %s1500_s18 = sld [smem:[#allocation3 + $0x21]] }
  0x2a   :  { %s1502_s19 = sld [smem:[#allocation3 + $0x29]] }
  0x2b   :  { %2600 = sst [smem:[#allocation26_spill]] %s1492_s14  ;;  %v144_v4 = vstv %s1492_s14 }
  0x2c   :  { %2601 = sst [smem:[#allocation27_spill]] %s1494_s15  ;;  %v179_v5 = vstv %s1494_s15 }
  0x2d   :  { %v1486_v3 = vpop.eup %1226  ;;  %127 = vrot.lane.b32.xlu0 %v1482_v0, %s1407_s7  ;;  %2602 = sst [smem:[#allocation28_spill]] %s1496_s16  ;;  %v214_v6 = vstv %s1496_s16 }
  0x2e   :  { %131 = vrot.lane.b32.xlu1 %v1486_v3, %s1405_s4  ;;  %133 = vrot.lane.b32.xlu2 %v1486_v3, %s1407_s7  ;;  %2603 = sst [smem:[#allocation29_spill]] %s1498_s17  ;;  %v249_v7 = vstv %s1498_s17 }
  0x2f   :  { %2604 = sst [smem:[#allocation30_spill]] %s1500_s18  ;;  %v284_v8 = vstv %s1500_s18 }
  0x30   :  { %2605 = sst [smem:[#allocation31_spill]] %s1502_s19  ;;  %v319_v9 = vstv %s1502_s19 }
  0x31   :  { %s1504_s20 = sld [smem:[#allocation3 + $0x31]] }
  0x32   :  { %s1506_s21 = sld [smem:[#allocation3 + $0x39]] }
  0x33   :  { %s1508_s1 = sld [smem:[#allocation3 + $0x41]] }
  0x34   :  { %s1510_s22 = sld [smem:[#allocation3 + $0x49]] }
  0x35   :  { %s1512_s23 = sld [smem:[#allocation3 + $0x3]] }
  0x36   :  { %135 = vrot.lane.b32.xlu2 %v1486_v3, %s1406_s6  ;;  %s1514_s3 = sld [smem:[#allocation3 + $0xb]] }
  0x37   :  { %2606 = sst [smem:[#allocation32_spill]] %s1504_s20  ;;  %v354_v10 = vstv %s1504_s20 }
  0x38   :  { %2607 = sst [smem:[#allocation33_spill]] %s1506_s21  ;;  %v389_v11 = vstv %s1506_s21 }
  0x39   :  { %2608 = sst [smem:[#allocation34_spill]] %s1508_s1  ;;  %v424_v12 = vstv %s1508_s1 }
  0x3a   :  { %2609 = sst [smem:[#allocation35_spill]] %s1510_s22  ;;  %v459_v13 = vstv %s1510_s22 }
  0x3b   :  { %2610 = sst [smem:[#allocation36_spill]] %s1512_s23 }
  0x3c   :  { %2611 = sst [smem:[#allocation37_spill]] %s1514_s3 }
  0x3d   :  { %s1516_s24 = sld [smem:[#allocation3 + $0x13]] }
  0x3e   :  { %s1518_s25 = sld [smem:[#allocation3 + $0x1b]] }
  0x3f   :  { %s1520_s26 = sld [smem:[#allocation3 + $0x23]] }
  0x40   :  { %s1522_s27 = sld [smem:[#allocation3 + $0x2b]] }
  0x41   :  { %s1524_s28 = sld [smem:[#allocation3 + $0x33]] }
  0x42   :  { %s1526_s0 = sld [smem:[#allocation3 + $0x3b]] }
  0x43   :  { %2612 = sst [smem:[#allocation38_spill]] %s1516_s24 }
  0x44   :  { %2613 = sst [smem:[#allocation39_spill]] %s1518_s25 }
  0x45   :  { %2614 = sst [smem:[#allocation40_spill]] %s1520_s26 }
  0x46   :  { %2615 = sst [smem:[#allocation41_spill]] %s1522_s27 }
  0x47   :  { %2616 = sst [smem:[#allocation42_spill]] %s1524_s28 }
  0x48   :  { %2617 = sst [smem:[#allocation43_spill]] %s1526_s0 }
  0x49   :  { %s1528_s29 = sld [smem:[#allocation3 + $0x43]] }
  0x4a   :  { %s1530_s30 = sld [smem:[#allocation3 + $0x4b]] }
  0x4b   :  { %s1532_s2 = sld [smem:[#allocation7]] }
  0x4c   :  { %s1534_s10 = sld [smem:[#allocation3]] }
  0x4d   :  { %s1536_s11 = sld [smem:[#allocation3 + $0x2]] }
  0x4e   :  { %s1538_s12 = sld [smem:[#allocation7 + $0x1]] }
  0x4f   :  { %2618 = sst [smem:[#allocation44_spill]] %s1528_s29 }
  0x50   :  { %2619 = sst [smem:[#allocation45_spill]] %s1530_s30 }
  0x51   :  { %s1540_s13 = sld [smem:[#allocation3 + $0x8]]  ;;  %v141_v21 = vstv %s1532_s2 }
  0x52   :  { %s1542_s4 = sld [smem:[#allocation3 + $0xa]]  ;;  %v139_v14 = vstv %s1534_s10 }
  0x53   :  { %2620 = sst [smem:[#allocation46_spill]] %s1536_s11  ;;  %v140_v48 = vmul.f32 %v139_v14, %v1482_v0 }
  0x54   :  { %s1544_s6 = sld [smem:[#allocation7 + $0x2]]  ;;  %v176_v22 = vstv %s1538_s12 }
  0x55   :  { %s1546_s7 = sld [smem:[#allocation3 + $0x10]]  ;;  %v1711_v63 = vadd.f32 %v141_v21, %v140_v48 }
  0x56   :  { %s1548_s8 = sld [smem:[#allocation3 + $0x12]] }
  0x57   :  { %s1550_s9 = sld [smem:[#allocation7 + $0x3]]  ;;  %v174_v15 = vstv %s1540_s13 }
  0x58   :  { %2621 = sst [smem:[#allocation47_spill]] %s1542_s4  ;;  %v175_v49 = vmul.f32 %v174_v15, %v1482_v0 }
  0x59   :  { %s1552_s5 = sld [smem:[#allocation3 + $0x18]] }
  0x5a   :  { %s1554_s30 = sld [smem:[#allocation3 + $0x1a]]  ;;  %v211_v23 = vstv %s1544_s6  ;;  %v1716_v2 = vadd.f32 %v176_v22, %v175_v49 }
  0x5b   :  { %s1556_s29 = sld [smem:[#allocation7 + $0x4]]  ;;  %v209_v16 = vstv %s1546_s7 }
  0x5c   :  { %2622 = sst [smem:[#allocation48_spill]] %s1548_s8  ;;  %v210_v50 = vmul.f32 %v209_v16, %v1482_v0 }
  0x5d   :  { %2623 = sst [smem:[#allocation49_spill]] %s1550_s9 }
  0x5e   :  { %s1558_s11 = sld [smem:[#allocation3 + $0x20]]  ;;  %v1718_v14 = vadd.f32 %v211_v23, %v210_v50 }
  0x5f   :  { %s1560_s0 = sld [smem:[#allocation3 + $0x22]]  ;;  %v244_v17 = vstv %s1552_s5 }
  0x60   :  { %2624 = sst [smem:[#allocation50_spill]] %s1554_s30  ;;  %v245_v51 = vmul.f32 %v244_v17, %v1482_v0 }
  0x61   :  { %2625 = sst [smem:[#allocation51_spill]] %s1556_s29 }
  0x62   :  { %s1562_s28 = sld [smem:[#allocation7 + $0x5]] }
  0x63   :  { %s1564_s4 = sld [smem:[#allocation3 + $0x28]] }
  0x64   :  { %s1566_s27 = sld [smem:[#allocation3 + $0x2a]]  ;;  %v279_v18 = vstv %s1558_s11 }
  0x65   :  { %2626 = sst [smem:[#allocation52_spill]] %s1560_s0  ;;  %v280_v52 = vmul.f32 %v279_v18, %v1482_v0 }
  0x66   :  { %s1568_s26 = sld [smem:[#allocation7 + $0x6]] }
  0x67   :  { %s1570_s8 = sld [smem:[#allocation3 + $0x30]] }
  0x68   :  { %2627 = sst [smem:[#allocation53_spill]] %s1562_s28 }
  0x69   :  { %s1572_s25 = sld [smem:[#allocation3 + $0x32]]  ;;  %v314_v19 = vstv %s1564_s4 }
  0x6a   :  { %2628 = sst [smem:[#allocation54_spill]] %s1566_s27  ;;  %v315_v54 = vmul.f32 %v314_v19, %v1482_v0 }
  0x6b   :  { %s1574_s9 = sld [smem:[#allocation7 + $0x7]] }
  0x6c   :  { %2629 = sst [smem:[#allocation55_spill]] %s1568_s26 }
  0x6d   :  { %s1576_s30 = sld [smem:[#allocation3 + $0x38]]  ;;  %v349_v20 = vstv %s1570_s8 }
  0x6e   :  { %s1578_s29 = sld [smem:[#allocation3 + $0x3a]]  ;;  %v350_v55 = vmul.f32 %v349_v20, %v1482_v0 }
  0x6f   :  { %2630 = sst [smem:[#allocation56_spill]] %s1572_s25 }
  0x70   :  { %s1580_s24 = sld [smem:[#allocation7 + $0x8]] }
  0x71   :  { %2631 = sst [smem:[#allocation57_spill]] %s1574_s9 }
  0x72   :  { %s1582_s0 = sld [smem:[#allocation3 + $0x40]] }
  0x73   :  { %s1584_s28 = sld [smem:[#allocation3 + $0x42]]  ;;  %v384_v24 = vstv %s1576_s30 }
  0x74   :  { %2632 = sst [smem:[#allocation58_spill]] %s1578_s29  ;;  %v385_v56 = vmul.f32 %v384_v24, %v1482_v0 }
  0x75   :  { %s1586_s3 = sld [smem:[#allocation7 + $0x9]] }
  0x76   :  { %2633 = sst [smem:[#allocation59_spill]] %s1580_s24 }
  0x77   :  { %s1588_s27 = sld [smem:[#allocation3 + $0x48]] }
  0x78   :  { %s1590_s26 = sld [smem:[#allocation3 + $0x4a]]  ;;  %v419_v46 = vstv %s1582_s0 }
  0x79   :  { %2634 = sst [smem:[#allocation60_spill]] %s1584_s28  ;;  %v420_v60 = vmul.f32 %v419_v46, %v1482_v0 }
  0x7a   :  { %s1592_s25 = sld [smem:[#allocation3 + $0x6]] }
  0x7b   :  { %2635 = sst [smem:[#allocation61_spill]] %s1586_s3 }
  0x7c   :  { %s1594_s9 = sld [smem:[#allocation3 + $0xe]] }
  0x7d   :  { %s1596_s23 = sld [smem:[#allocation3 + $0x16]]  ;;  %v454_v47 = vstv %s1588_s27 }
  0x7e   :  { %2636 = sst [smem:[#allocation62_spill]] %s1590_s26  ;;  %v455_v1 = vmul.f32 %v454_v47, %v1482_v0 }
  0x7f   :  { %s1598_s24 = sld [smem:[#allocation3 + $0x1e]] }
  0x80   :  { %2637 = sst [smem:[#allocation63_spill]] %s1592_s25 }
  0x81   :  { %s1600_s29 = sld [smem:[#allocation3 + $0x26]] }
  0x82   :  { %2638 = sst [smem:[#allocation64_spill]] %s1594_s9 }
  0x83   :  { %2639 = sst [smem:[#allocation65_spill]] %s1596_s23 }
  0x84   :  { %s1602_s3 = sld [smem:[#allocation3 + $0x2e]] }
  0x85   :  { %2640 = sst [smem:[#allocation66_spill]] %s1598_s24 }
  0x86   :  { %s1604_s28 = sld [smem:[#allocation3 + $0x36]] }
  0x87   :  { %2641 = sst [smem:[#allocation67_spill]] %s1600_s29 }
  0x88   :  { %s1606_s26 = sld [smem:[#allocation3 + $0x3e]]  ;;  %v134_v20 = vpop.permute.xlu2 %133 }
  0x89   :  { %s1608_s25 = sld [smem:[#allocation3 + $0x46]] }
  0x8a   :  { %2642 = sst [smem:[#allocation68_spill]] %s1602_s3 }
  0x8b   :  { %s1610_s9 = sld [smem:[#allocation3 + $0x4e]] }
  0x8c   :  { %2643 = sst [smem:[#allocation69_spill]] %s1604_s28 }
  0x8d   :  { %s1612_s23 = sld [smem:[#allocation3 + $0x4]] }
  0x8e   :  { %s1614_s24 = sld [smem:[#allocation3 + $0x5]]  ;;  %v409_v46 = vstv %s1606_s26 }
  0x8f   :  { %2644 = sst [smem:[#allocation70_spill]] %s1608_s25 }
  0x90   :  { %s1616_s29 = sld [smem:[#allocation3 + $0xc]]  ;;  %v1833_v57 = vpop.permute.xlu2 %135 }
  0x91   :  { %s1618_s3 = sld [smem:[#allocation3 + $0xd]]  ;;  %v479_v48 = vstv %s1610_s9 }
  0x92   :  { %s1620_s28 = sld [smem:[#allocation3 + $0x14]] }
  0x93   :  { %s1623_s25 = sld [smem:[#allocation3 + $0x15]] }
  0x94   :  { %2645 = sst [smem:[#allocation71_spill]] %s1614_s24 }
  0x95   :  { %s1629_s24 = sld [smem:[#allocation3 + $0x1c]] }
  0x96   :  { %s1635_s14 = sld [smem:[#allocation3 + $0x1d]] }
  0x97   :  { %2646 = sst [smem:[#allocation72_spill]] %s1618_s3  ;;  %v1853_v39 = vpop.permute.xlu0 %125  ;;  %v1855_v38 = vpop.permute.xlu1 %129 }
  0x98   :  { %s2650_s15 = sld [smem:[#allocation37_spill]]  ;;  %2711 = vst [vmem:[#allocation79_spill] sm:$0xff] %v1853_v39 }
  0x99   :  { %2647 = sst [smem:[#allocation73_spill]] %s1623_s25 }
  0x9a   :  { %s2649_s25 = sld [smem:[#allocation36_spill]] }
  0x9b   :  { %s2651_s16 = sld [smem:[#allocation38_spill]] }
  0x9c   :  { %2648 = sst [smem:[#allocation74_spill]] %s1635_s14 }
  0x9d   :  { %s2652_s17 = sld [smem:[#allocation49_spill]] }
  0x9e   :  { %s1641_s18 = sld [smem:[#allocation3 + $0x24]]  ;;  %v187_v26 = vstv %s2650_s15 }
  0x9f   :  { %s2654_s3 = sld [smem:[#allocation39_spill]] }
  0xa0   :  { %s2655_s19 = sld [smem:[#allocation40_spill]]  ;;  %v152_v25 = vstv %s2649_s25 }
  0xa1   :  { %s2656_s20 = sld [smem:[#allocation41_spill]]  ;;  %v222_v27 = vstv %s2651_s16 }
  0xa2   :  { %s2657_s21 = sld [smem:[#allocation42_spill]] }
  0xa3   :  { %s1647_s1 = sld [smem:[#allocation3 + $0x25]]  ;;  %v246_v28 = vstv %s2652_s17 }
  0xa4   :  { %2653 = sst [smem:[#allocation36_spill]] %s1641_s18  ;;  %v1720_v15 = vadd.f32 %v246_v28, %v245_v51 }
  0xa5   :  { %s2659_s14 = sld [smem:[#allocation43_spill]]  ;;  %v257_v29 = vstv %s2654_s3 }
  0xa6   :  { %s2660_s22 = sld [smem:[#allocation44_spill]]  ;;  %v292_v30 = vstv %s2655_s19 }
  0xa7   :  { %s1653_s7 = sld [smem:[#allocation3 + $0x2c]]  ;;  %v327_v31 = vstv %s2656_s20 }
  0xa8   :  { %s2667_s4 = sld [smem:[#allocation51_spill]]  ;;  %v362_v32 = vstv %s2657_s21 }
  0xa9   :  { %2658 = sst [smem:[#allocation37_spill]] %s1647_s1 }
  0xaa   :  { %s1659_s8 = sld [smem:[#allocation3 + $0x2d]] }
  0xab   :  { %s2669_s2 = sld [smem:[#allocation53_spill]]  ;;  %v397_v33 = vstv %s2659_s14 }
  0xac   :  { %s2671_s6 = sld [smem:[#allocation55_spill]]  ;;  %v432_v34 = vstv %s2660_s22 }
  0xad   :  { %2663 = sst [smem:[#allocation38_spill]] %s1653_s7 }
  0xae   :  { %s1665_s30 = sld [smem:[#allocation3 + $0x34]]  ;;  %v281_v40 = vstv %s2667_s4 }
  0xaf   :  { %s1671_s17 = sld [smem:[#allocation3 + $0x35]]  ;;  %v1722_v16 = vadd.f32 %v281_v40, %v280_v52 }
  0xb0   :  { %s1677_s19 = sld [smem:[#allocation3 + $0x3c]] }
  0xb1   :  { %s2673_s20 = sld [smem:[#allocation57_spill]]  ;;  %v316_v42 = vstv %s2669_s2 }
  0xb2   :  { %v351_v44 = vstv %s2671_s6  ;;  %s1683_s21 = sld [smem:[#allocation3 + $0x3d]]  ;;  %v1726_v17 = vadd.f32 %v316_v42, %v315_v54 }
  0xb3   :  { %s2675_s22 = sld [smem:[#allocation59_spill]]  ;;  %v1728_v0 = vadd.f32 %v351_v44, %v350_v55 }
  0xb4   :  { %s1689_s5 = sld [smem:[#allocation3 + $0x44]] }
  0xb5   :  { %s2677_s4 = sld [smem:[#allocation61_spill]] }
  0xb6   :  { %s1695_s2 = sld [smem:[#allocation3 + $0x45]]  ;;  %v401_v35 = vstv %s1677_s19 }
  0xb7   :  { %v386_v53 = vstv %s2673_s20  ;;  %s1701_s27 = sld [smem:[#allocation3 + $0x4c]] }
  0xb8   :  { %s2679_s0 = sld [smem:[#allocation63_spill]]  ;;  %v1730_v18 = vadd.f32 %v386_v53, %v385_v56  ;;  %v156_v53 = vstv %s1612_s23 }
  0xb9   :  { %v421_v58 = vstv %s2675_s22  ;;  %s1707_s6 = sld [smem:[#allocation3 + $0x4d]] }
  0xba   :  { %s2680_s7 = sld [smem:[#allocation64_spill]]  ;;  %v1735_v21 = vadd.f32 %v421_v58, %v420_v60  ;;  %v191_v58 = vstv %s1616_s29  ;;  %v1774_v60 = vmul.f32 %v409_v46, %v134_v20 }
  0xbb   :  { %v456_v61 = vstv %s2677_s4  ;;  %s2681_s20 = sld [smem:[#allocation65_spill]] }
  0xbc   :  { %s2682_s12 = sld [smem:[#allocation66_spill]]  ;;  %v1742_v28 = vadd.f32 %v456_v61, %v455_v1  ;;  %2693 = vst [vmem:[#allocation76_spill] sm:$0xff] %v1774_v60  ;;  %v226_v1 = vstv %s1620_s28 }
  0xbd   :  { %s1714_s11 = sld [smem:[#allocation3 + $0x7]] }
  0xbe   :  { %s2683_s22 = sld [smem:[#allocation67_spill]]  ;;  %v164_v19 = vstv %s2679_s0 }
  0xbf   :  { %s2684_s10 = sld [smem:[#allocation68_spill]]  ;;  %v1752_v49 = vmul.f32 %v164_v19, %v134_v20  ;;  %v261_v19 = vstv %s1629_s24 }
  0xc0   :  { %s2685_s4 = sld [smem:[#allocation69_spill]]  ;;  %v199_v22 = vstv %s2680_s7 }
  0xc1   :  { %s1724_s1 = sld [smem:[#allocation3 + $0xf]]  ;;  %v234_v23 = vstv %s2681_s20  ;;  %v1756_v50 = vmul.f32 %v199_v22, %v134_v20  ;;  %v1782_v22 = vmul.f32 %v479_v48, %v134_v20  ;;  %v436_v48 = vstv %s1689_s5 }
  0xc2   :  { %s2686_s14 = sld [smem:[#allocation70_spill]]  ;;  %v269_v24 = vstv %s2682_s12  ;;  %v1758_v51 = vmul.f32 %v234_v23, %v134_v20  ;;  %v1785_v23 = vmul.f32 %v1486_v3, %v156_v53  ;;  %v1804_v53 = vmul.f32 %v1486_v3, %v261_v19 }
  0xc3   :  { %s1733_s18 = sld [smem:[#allocation3 + $0x17]]  ;;  %v1760_v52 = vmul.f32 %v269_v24, %v134_v20  ;;  %2698 = vst [vmem:[#allocation78_spill] sm:$0xff] %v1782_v22  ;;  %v1829_v24 = vmul.f32 %v1486_v3, %v401_v35  ;;  %v168_v59 = vstv %s1714_s11 }
  0xc4   :  { %s1740_s13 = sld [smem:[#allocation3 + $0x1f]]  ;;  %v304_v40 = vstv %s2683_s22 }
  0xc5   :  { %v339_v42 = vstv %s2684_s10  ;;  %s1747_s3 = sld [smem:[#allocation3 + $0x27]]  ;;  %v1765_v54 = vmul.f32 %v304_v40, %v134_v20 }
  0xc6   :  { %v374_v44 = vstv %s2685_s4  ;;  %s1754_s7 = sld [smem:[#allocation3 + $0x2f]]  ;;  %v1767_v55 = vmul.f32 %v339_v42, %v134_v20  ;;  %v1792_v42 = vmul.f32 %v1486_v3, %v191_v58  ;;  %v471_v58 = vstv %s1701_s27 }
  0xc7   :  { %s2687_s12 = sld [smem:[#allocation71_spill]]  ;;  %v1769_v56 = vmul.f32 %v374_v44, %v134_v20  ;;  %v1848_v62 = vmul.f32 %v1486_v3, %v471_v58 }
  0xc8   :  { %v444_v47 = vstv %s2686_s14  ;;  %s2688_s10 = sld [smem:[#allocation36_spill]] }
  0xc9   :  { %s1763_s0 = sld [smem:[#allocation3 + $0x37]]  ;;  %2691 = vst [vmem:[#allocation75_spill] sm:$0xff] %v1769_v56  ;;  %v1776_v61 = vmul.f32 %v444_v47, %v134_v20  ;;  %v366_v47 = vstv %s1665_s30  ;;  %v1800_v20 = vmul.f32 %v1486_v3, %v226_v1 }
  0xca   :  { %s2689_s14 = sld [smem:[#allocation72_spill]]  ;;  %v1821_v19 = vmul.f32 %v1486_v3, %v366_v47  ;;  %v238_v47 = vstv %s1733_s18  ;;  %v273_v45 = vstv %s1740_s13 }
  0xcb   :  { %s2690_s9 = sld [smem:[#allocation38_spill]]  ;;  %2695 = vst [vmem:[#allocation77_spill] sm:$0xff] %v1776_v61  ;;  %v308_v43 = vstv %s1747_s3  ;;  %v1869_v41 = vmul.f32 %v238_v47, %v1833_v57  ;;  %v1872_v37 = vmul.f32 %v273_v45, %v1833_v57  ;;  %v215_v47 = vmul.f32 %v214_v6, %v1853_v39 }
  0xcc   :  { %s1772_s26 = sld [smem:[#allocation3 + $0x3f]]  ;;  %v1875_v35 = vmul.f32 %v308_v43, %v1833_v57  ;;  %v250_v45 = vmul.f32 %v249_v7, %v1853_v39  ;;  %v285_v43 = vmul.f32 %v284_v8, %v1853_v39  ;;  %v390_v6 = vmul.f32 %v389_v11, %v1853_v39 }
  0xcd   :  { %s2694_s20 = sld [smem:[#allocation73_spill]]  ;;  %v425_v7 = vmul.f32 %v424_v12, %v1853_v39  ;;  %v153_v8 = vmul.f32 %v152_v25, %v1855_v38  ;;  %v258_v11 = vmul.f32 %v257_v29, %v1855_v38  ;;  %v293_v12 = vmul.f32 %v292_v30, %v1855_v38 }
  0xce   :  { %s1780_s23 = sld [smem:[#allocation3 + $0x47]]  ;;  %v296_v40 = vstv %s2688_s10  ;;  %2719 = vst [vmem:[#allocation80_spill] sm:$0xff] %v1875_v35  ;;  %v1938_v25 = vmul.f32 %v362_v32, %v1855_v38  ;;  %v251_v32 = vadd.f32 %v250_v45, %v1720_v15  ;;  %v391_v36 = vadd.f32 %v390_v6, %v1730_v18 }
  0xcf   :  { %s2697_s22 = sld [smem:[#allocation74_spill]]  ;;  %v1811_v44 = vmul.f32 %v1486_v3, %v296_v40  ;;  %v1844_v40 = vmul.f32 %v1486_v3, %v436_v48  ;;  %v460_v48 = vmul.f32 %v459_v13, %v1853_v39  ;;  %v328_v13 = vmul.f32 %v327_v31, %v1855_v38 }
  0xd0   :  { %s2699_s4 = sld [smem:[#allocation37_spill]]  ;;  %v216_v31 = vadd.f32 %v215_v47, %v1718_v14 }
  0xd1   :  { %s1789_s29 = sld [smem:[#allocation3 + $0x4f]]  ;;  %v331_v46 = vstv %s2690_s9 }
  0xd2   :  { %2692 = sst [smem:[#allocation49_spill]] %s1772_s26  ;;  %v1818_v1 = vmul.f32 %v1486_v3, %v331_v46  ;;  %v203_v46 = vstv %s1724_s1  ;;  %v1861_v3 = vmul.f32 %v168_v59, %v1833_v57  ;;  %v145_v59 = vmul.f32 %v144_v4, %v1853_v39 }
  0xd3   :  { %s1797_s24 = sld [smem:[#allocation10]]  ;;  %v1866_v58 = vmul.f32 %v203_v46, %v1833_v57  ;;  %v180_v46 = vmul.f32 %v179_v5, %v1853_v39  ;;  %v320_v4 = vmul.f32 %v319_v9, %v1853_v39  ;;  %v355_v5 = vmul.f32 %v354_v10, %v1853_v39 }
  0xd4   :  { %2696 = sst [smem:[#allocation51_spill]] %s1780_s23  ;;  %v188_v9 = vmul.f32 %v187_v26, %v1855_v38  ;;  %v223_v10 = vmul.f32 %v222_v27, %v1855_v38  ;;  %v1943_v26 = vmul.f32 %v397_v33, %v1855_v38  ;;  %v1948_v27 = vmul.f32 %v432_v34, %v1855_v38  ;;  %v128_v34 = vpop.permute.xlu0 %127 }
  0xd5   :  { %s1807_s28 = sld [smem:[#allocation9]]  ;;  %v146_v29 = vadd.f32 %v145_v59, %v1711_v63  ;;  %v181_v30 = vadd.f32 %v180_v46, %v1716_v2  ;;  %v286_v33 = vadd.f32 %v285_v43, %v1722_v16  ;;  %v321_v63 = vadd.f32 %v320_v4, %v1726_v17 }
  0xd6   :  { %s1815_s30 = sld [smem:[#allocation9 + $0x1]]  ;;  %v356_v59 = vadd.f32 %v355_v5, %v1728_v0  ;;  %v426_v2 = vadd.f32 %v425_v7, %v1735_v21  ;;  %v1983_v7 = vpop.permute.xlu1 %131 }
  0xd7   :  { %2700 = sst [smem:[#allocation53_spill]] %s1789_s29 }
  0xd8   :  { %s1825_s19 = sld [smem:[#allocation9 + $0x2]] }
  0xd9   :  { %2701 = sst [smem:[#allocation55_spill]] %s1797_s24 }
  0xda   :  { %s1835_s10 = sld [smem:[#allocation9 + $0x3]] }
  0xdb   :  { %s1841_s5 = sld [smem:[#allocation9 + $0x4]] }
  0xdc   :  { %2702 = sst [smem:[#allocation57_spill]] %s1815_s30 }
  0xdd   :  { %s1877_s29 = sld [smem:[#allocation9 + $0x7]] }
  0xde   :  { %2703 = sst [smem:[#allocation59_spill]] %s1825_s19 }
  0xdf   :  { %s1851_s19 = sld [smem:[#allocation9 + $0x5]] }
  0xe0   :  { %2704 = sst [smem:[#allocation61_spill]] %s1835_s10 }
  0xe1   :  { %2705 = sst [smem:[#allocation63_spill]] %s1841_s5 }
  0xe2   :  { %s1863_s5 = sld [smem:[#allocation9 + $0x6]] }
  0xe3   :  { %2720 = sst [smem:[#allocation66_spill]] %s1877_s29 }
  0xe4   :  { %s1891_s23 = sld [smem:[#allocation9 + $0x8]] }
  0xe5   :  { %2709 = sst [smem:[#allocation64_spill]] %s1851_s19 }
  0xe6   :  { %s1905_s10 = sld [smem:[#allocation9 + $0x9]] }
  0xe7   :  { %s1919_s9 = sld [smem:[#allocation10 + $0x1]] }
  0xe8   :  { %2716 = sst [smem:[#allocation65_spill]] %s1863_s5 }
  0xe9   :  { %s1933_s30 = sld [smem:[#allocation9 + $0xa]] }
  0xea   :  { %s2727_s15 = sld [smem:[#allocation46_spill]] }
  0xeb   :  { %s2728_s16 = sld [smem:[#allocation47_spill]] }
  0xec   :  { %s2729_s25 = sld [smem:[#allocation48_spill]] }
  0xed   :  { %s2730_s26 = sld [smem:[#allocation50_spill]] }
  0xee   :  { %s1951_s24 = sld [smem:[#allocation9 + $0xb]] }
  0xef   :  { %s2731_s29 = sld [smem:[#allocation52_spill]] }
  0xf0   :  { %s2732_s19 = sld [smem:[#allocation54_spill]]  ;;  %v2735_v14 = vstv %s2727_s15 }
  0xf1   :  { %s2733_s5 = sld [smem:[#allocation56_spill]]  ;;  %v149_v46 = vmul.f32 %v2735_v14, %v128_v34  ;;  %v2736_v15 = vstv %s2728_s16 }
  0xf2   :  { %s2734_s18 = sld [smem:[#allocation58_spill]]  ;;  %v184_v47 = vmul.f32 %v2736_v15, %v128_v34  ;;  %v2737_v45 = vstv %s2729_s25 }
  0xf3   :  { %s1957_s1 = sld [smem:[#allocation9 + $0xc]]  ;;  %v219_v16 = vmul.f32 %v2737_v45, %v128_v34  ;;  %v2738_v43 = vstv %s2730_s26  ;;  %v150_v14 = vadd.f32 %v149_v46, %v146_v29 }
  0xf4   :  { %s1963_s3 = sld [smem:[#allocation9 + $0xd]]  ;;  %v254_v39 = vmul.f32 %v2738_v43, %v128_v34  ;;  %v185_v15 = vadd.f32 %v184_v47, %v181_v30  ;;  %v2747_v30 = vstv %s2687_s12  ;;  %v2750_v47 = vstv %s2697_s22 }
  0xf5   :  { %s1973_s13 = sld [smem:[#allocation9 + $0xe]]  ;;  %v2739_v22 = vstv %s2731_s29  ;;  %v220_v45 = vadd.f32 %v219_v16, %v216_v31  ;;  %v154_v29 = vadd.f32 %v153_v8, %v150_v14  ;;  %v161_v31 = vmul.f32 %v2747_v30, %v1983_v7 }
  0xf6   :  { %v289_v17 = vmul.f32 %v2739_v22, %v128_v34  ;;  %v2740_v4 = vstv %s2732_s19  ;;  %s2741_s27 = sld [smem:[#allocation60_spill]]  ;;  %v255_v43 = vadd.f32 %v254_v39, %v251_v32  ;;  %v189_v39 = vadd.f32 %v188_v9, %v185_v15 }
  0xf7   :  { %v324_v0 = vmul.f32 %v2740_v4, %v128_v34  ;;  %v2742_v18 = vstv %s2733_s5  ;;  %s2743_s11 = sld [smem:[#allocation62_spill]]  ;;  %v2748_v32 = vstv %s2689_s14  ;;  %v158_v8 = vadd.f32 %v1785_v23, %v154_v29 }
  0xf8   :  { %v359_v21 = vmul.f32 %v2742_v18, %v128_v34  ;;  %v2744_v5 = vstv %s2734_s18  ;;  %s1985_s15 = sld [smem:[#allocation9 + $0xf]]  ;;  %v290_v22 = vadd.f32 %v289_v17, %v286_v33  ;;  %v461_v18 = vadd.f32 %v460_v48, %v1742_v28 }
  0xf9   :  { %v394_v6 = vmul.f32 %v2744_v5, %v128_v34  ;;  %s1987_s16 = sld [smem:[#allocation9 + $0x10]]  ;;  %v325_v4 = vadd.f32 %v324_v0, %v321_v63  ;;  %v196_v33 = vmul.f32 %v2748_v32, %v1983_v7  ;;  %v224_v63 = vadd.f32 %v223_v10, %v220_v45 }
  0xfa   :  { %v360_v61 = vadd.f32 %v359_v21, %v356_v59  ;;  %s1990_s25 = sld [smem:[#allocation9 + $0x11]]  ;;  %v2749_v28 = vstv %s2694_s20  ;;  %v193_v46 = vadd.f32 %v1792_v42, %v189_v39  ;;  %v266_v10 = vmul.f32 %v2750_v47, %v1983_v7 }
  0xfb   :  { %s1999_s26 = sld [smem:[#allocation9 + $0x12]]  ;;  %v231_v48 = vmul.f32 %v2749_v28, %v1983_v7  ;;  %v395_v59 = vadd.f32 %v394_v6, %v391_v36  ;;  %v228_v9 = vadd.f32 %v1800_v20, %v224_v63  ;;  %v294_v16 = vadd.f32 %v293_v12, %v290_v22 }
  0xfc   :  { %v2745_v5 = vstv %s2741_s27  ;;  %s2007_s29 = sld [smem:[#allocation9 + $0x13]]  ;;  %v2752_v23 = vstv %s2699_s4  ;;  %v162_v42 = vadd.f32 %v161_v31, %v158_v8  ;;  %v197_v17 = vadd.f32 %v196_v33, %v193_v46 }
  0xfd   :  { %v429_v60 = vmul.f32 %v2745_v5, %v128_v34  ;;  %v2746_v35 = vstv %s2743_s11  ;;  %s2010_s12 = sld [smem:[#allocation10 + $0x2]]  ;;  %v232_v20 = vadd.f32 %v231_v48, %v228_v9  ;;  %v298_v0 = vadd.f32 %v1811_v44, %v294_v16  ;;  %v2773_v16 = vld [vmem:[#allocation76_spill] sm:$0xff] }
  0xfe   :  { %v464_v56 = vmul.f32 %v2746_v35, %v128_v34  ;;  %v259_v34 = vadd.f32 %v258_v11, %v255_v43  ;;  %s2017_s14 = sld [smem:[#allocation9 + $0x14]]  ;;  %v301_v11 = vmul.f32 %v2752_v23, %v1983_v7  ;;  %v364_v21 = vadd.f32 %v1938_v25, %v360_v61 }
  0xff   :  { %v430_v35 = vadd.f32 %v429_v60, %v426_v2  ;;  %s2751_s20 = sld [smem:[#allocation45_spill]]  ;;  %v329_v2 = vadd.f32 %v328_v13, %v325_v4  ;;  %v2754_v13 = vstv %s1671_s17  ;;  %v399_v44 = vadd.f32 %v1943_v26, %v395_v59 }
 0x100   :  { %v465_v36 = vadd.f32 %v464_v56, %v461_v18  ;;  %v263_v60 = vadd.f32 %v1804_v53, %v259_v34  ;;  %s2023_s19 = sld [smem:[#allocation9 + $0x15]]  ;;  %v2753_v56 = vstv %s1659_s8  ;;  %v371_v6 = vmul.f32 %v2754_v13, %v1983_v7 }
 0x101   :  { %s2026_s22 = sld [smem:[#allocation9 + $0x16]]  ;;  %v333_v12 = vadd.f32 %v1818_v1, %v329_v2  ;;  %v336_v53 = vmul.f32 %v2753_v56, %v1983_v7  ;;  %v434_v43 = vadd.f32 %v1948_v27, %v430_v35  ;;  %v302_v1 = vadd.f32 %v301_v11, %v298_v0  ;;  %v2768_v35 = vld [vmem:[#allocation75_spill] sm:$0xff]  ;;  %v2778_v56 = vld [vmem:[#allocation77_spill] sm:$0xff] }
 0x102   :  { %s2036_s4 = sld [smem:[#allocation9 + $0x17]]  ;;  %v267_v45 = vadd.f32 %v266_v10, %v263_v60  ;;  %v368_v61 = vadd.f32 %v1821_v19, %v364_v21  ;;  %v2756_v25 = vstv %s1683_s21  ;;  %v2757_v4 = vstv %s1754_s7  ;;  %v2772_v10 = vld [vmem:[#allocation80_spill] sm:$0xff] }
 0x103   :  { %s2043_s5 = sld [smem:[#allocation9 + $0x18]]  ;;  %v406_v22 = vmul.f32 %v2756_v25, %v1983_v7  ;;  %v344_v18 = vmul.f32 %v2757_v4, %v1833_v57  ;;  %v166_v26 = vadd.f32 %v1752_v49, %v162_v42  ;;  %v489_v27 = vstv %s1807_s28 }
 0x104   :  { %s2052_s8 = sld [smem:[#allocation9 + $0x19]]  ;;  %v337_v29 = vadd.f32 %v336_v53, %v333_v12  ;;  %v372_v30 = vadd.f32 %v371_v6, %v368_v61  ;;  %v201_v19 = vadd.f32 %v1756_v50, %v197_v17  ;;  %v236_v31 = vadd.f32 %v1758_v51, %v232_v20 }
 0x105   :  { %v2755_v14 = vstv %s2751_s20  ;;  %s2057_s17 = sld [smem:[#allocation9 + $0x1a]]  ;;  %v438_v39 = vadd.f32 %v1844_v40, %v434_v43  ;;  %v2760_v32 = vstv %s1695_s2  ;;  %v170_v33 = vadd.f32 %v1861_v3, %v166_v26  ;;  %v2782_v43 = vld [vmem:[#allocation78_spill] sm:$0xff] }
 0x106   :  { %v468_v15 = vmul.f32 %v2755_v14, %v1855_v38  ;;  %v403_v38 = vadd.f32 %v1829_v24, %v399_v44  ;;  %s2061_s21 = sld [smem:[#allocation9 + $0x1b]]  ;;  %v441_v24 = vmul.f32 %v2760_v32, %v1983_v7  ;;  %v271_v49 = vadd.f32 %v1760_v52, %v267_v45 }
 0x107   :  { %s2069_s7 = sld [smem:[#allocation9 + $0x1c]]  ;;  %v205_v50 = vadd.f32 %v1866_v58, %v201_v19  ;;  %v240_v51 = vadd.f32 %v1869_v41, %v236_v31  ;;  %v306_v40 = vadd.f32 %v1765_v54, %v302_v1  ;;  %v2766_v3 = vstv %s1707_s6 }
 0x108   :  { %v469_v5 = vadd.f32 %v468_v15, %v465_v36  ;;  %v407_v63 = vadd.f32 %v406_v22, %v403_v38  ;;  %s2762_s28 = sld [smem:[#allocation51_spill]]  ;;  %v476_v48 = vmul.f32 %v2766_v3, %v1983_v7  ;;  %v2080_v52 = vmax.f32 %v170_v33, 0.0 }
 0x109   :  { %s2763_s18 = sld [smem:[#allocation49_spill]]  ;;  %v275_v59 = vadd.f32 %v1872_v37, %v271_v49  ;;  %v2085_v58 = vmax.f32 %v205_v50, 0.0  ;;  %v341_v41 = vadd.f32 %v1767_v55, %v337_v29  ;;  %v376_v54 = vadd.f32 %v2768_v35, %v372_v30 }
 0x10a   :  { %s2764_s27 = sld [smem:[#allocation55_spill]]  ;;  %v473_v28 = vadd.f32 %v1848_v62, %v469_v5  ;;  %v2769_v8 = vstv %s1763_s0  ;;  %v442_v7 = vadd.f32 %v441_v24, %v438_v39  ;;  %v2101_v47 = vmax.f32 %v240_v51, 0.0 }
 0x10b   :  { %2758 = sst [smem:[#allocation67_spill]] %s2057_s17  ;;  %v379_v62 = vmul.f32 %v2769_v8, %v1833_v57  ;;  %v310_v55 = vadd.f32 %v2772_v10, %v306_v40  ;;  %v411_v36 = vadd.f32 %v2773_v16, %v407_v63  ;;  %v490_v60 = vmul.f32 %v489_v27, %v2080_v52 }
 0x10c   :  { %2759 = sst [smem:[#allocation68_spill]] %s2061_s21  ;;  %v477_v23 = vadd.f32 %v476_v48, %v473_v28  ;;  %v2109_v2 = vmax.f32 %v275_v59, 0.0  ;;  %v345_v17 = vadd.f32 %v344_v18, %v341_v41  ;;  %v446_v53 = vadd.f32 %v2778_v56, %v442_v7 }
 0x10d   :  { %2761 = sst [smem:[#allocation69_spill]] %s2069_s7  ;;  %v380_v20 = vadd.f32 %v379_v62, %v376_v54  ;;  %v2123_v14 = vmax.f32 %v310_v55, 0.0  ;;  %v532_v27 = vstv %s1933_s30  ;;  %v534_v29 = vstv %s1919_s9 }
 0x10e   :  { %s2074_s11 = sld [smem:[#allocation9 + $0x1d]]  ;;  %v448_v34 = vstv %s2762_s28  ;;  %v481_v1 = vadd.f32 %v2782_v43, %v477_v23  ;;  %v2133_v22 = vmax.f32 %v345_v17, 0.0  ;;  %v533_v31 = vmul.f32 %v532_v27, %v2080_v52 }
 0x10f   :  { %s2083_s2 = sld [smem:[#allocation10 + $0x3]]  ;;  %v2771_v46 = vstv %s2763_s18  ;;  %v449_v21 = vmul.f32 %v448_v34, %v1833_v57  ;;  %v2135_v4 = vmax.f32 %v380_v20, 0.0  ;;  %v537_v24 = vstv %s1951_s24 }
 0x110   :  { %s2767_s20 = sld [smem:[#allocation53_spill]]  ;;  %v414_v37 = vmul.f32 %v2771_v46, %v1833_v57  ;;  %v491_v9 = vstv %s2764_s27  ;;  %v541_v33 = vstv %s1957_s1  ;;  %v535_v50 = vadd.f32 %v534_v29, %v533_v31 }
 0x111   :  { %s2092_s7 = sld [smem:[#allocation9 + $0x1e]]  ;;  %v492_v0 = vadd.f32 %v491_v9, %v490_v60  ;;  %v450_v5 = vadd.f32 %v449_v21, %v446_v53  ;;  %v538_v51 = vmul.f32 %v537_v24, %v2085_v58  ;;  %v545_v28 = vstv %s1963_s3 }
 0x112   :  { %s2099_s6 = sld [smem:[#allocation9 + $0x1f]]  ;;  %v415_v15 = vadd.f32 %v414_v37, %v411_v36  ;;  %v542_v41 = vmul.f32 %v541_v33, %v2101_v47  ;;  %v549_v8 = vstv %s1973_s13  ;;  %v575_v62 = vstv %s2017_s14 }
 0x113   :  { %s2774_s21 = sld [smem:[#allocation59_spill]]  ;;  %v539_v59 = vadd.f32 %v538_v51, %v535_v50  ;;  %v2168_v35 = vmax.f32 %v450_v5, 0.0  ;;  %v546_v37 = vmul.f32 %v545_v28, %v2109_v2  ;;  %v553_v9 = vstv %s1985_s15 }
 0x114   :  { %2765 = sst [smem:[#allocation70_spill]] %s2074_s11  ;;  %v576_v10 = vmul.f32 %v575_v62, %v2080_v52  ;;  %v577_v55 = vstv %s2010_s12  ;;  %v580_v16 = vstv %s2023_s19  ;;  %v522_v36 = vstv %s1891_s23 }
 0x115   :  { %s2770_s11 = sld [smem:[#allocation57_spill]]  ;;  %v543_v46 = vadd.f32 %v542_v41, %v539_v59  ;;  %v550_v23 = vmul.f32 %v549_v8, %v2123_v14  ;;  %v557_v17 = vstv %s1987_s16  ;;  %v554_v53 = vmul.f32 %v553_v9, %v2133_v22 }
 0x116   :  { %s2775_s0 = sld [smem:[#allocation61_spill]]  ;;  %v483_v11 = vstv %s2767_s20  ;;  %v578_v20 = vadd.f32 %v577_v55, %v576_v10  ;;  %v588_v21 = vstv %s2036_s4  ;;  %v565_v5 = vstv %s1999_s26 }
 0x117   :  { %s2106_s17 = sld [smem:[#allocation9 + $0x20]]  ;;  %v484_v61 = vmul.f32 %v483_v11, %v1833_v57  ;;  %v2145_v57 = vmax.f32 %v415_v15, 0.0  ;;  %v547_v60 = vadd.f32 %v546_v37, %v543_v46  ;;  %v584_v11 = vstv %s2026_s22 }
 0x118   :  { %s2112_s28 = sld [smem:[#allocation9 + $0x21]]  ;;  %v592_v15 = vstv %s2043_s5  ;;  %v596_v27 = vstv %s2052_s8  ;;  %v623_v31 = vstv %s2099_s6  ;;  %v569_v24 = vstv %s2007_s29 }
 0x119   :  { %s2777_s18 = sld [smem:[#allocation63_spill]]  ;;  %v498_v13 = vstv %s2774_s21  ;;  %v485_v39 = vadd.f32 %v484_v61, %v481_v1  ;;  %v551_v56 = vadd.f32 %v550_v23, %v547_v60  ;;  %v558_v1 = vmul.f32 %v557_v17, %v2135_v4 }
 0x11a   :  { %s2115_s27 = sld [smem:[#allocation9 + $0x22]]  ;;  %v499_v44 = vmul.f32 %v498_v13, %v2101_v47  ;;  %v561_v61 = vstv %s1990_s25 }
 0x11b   :  { %v494_v42 = vstv %s2770_s11  ;;  %s2121_s20 = sld [smem:[#allocation9 + $0x23]]  ;;  %v2170_v54 = vmax.f32 %v485_v39, 0.0  ;;  %v555_v43 = vadd.f32 %v554_v53, %v551_v56 }
 0x11c   :  { %v495_v12 = vmul.f32 %v494_v42, %v2085_v58  ;;  %v502_v6 = vstv %s2775_s0  ;;  %s2126_s11 = sld [smem:[#allocation9 + $0x24]]  ;;  %v526_v42 = vstv %s1905_s10 }
 0x11d   :  { %2776 = sst [smem:[#allocation71_spill]] %s2106_s17  ;;  %v503_v38 = vmul.f32 %v502_v6, %v2109_v2  ;;  %v585_v6 = vmul.f32 %v584_v11, %v2101_v47  ;;  %v559_v39 = vadd.f32 %v558_v1, %v555_v43  ;;  %v570_v41 = vmul.f32 %v569_v24, %v2170_v54 }
 0x11e   :  { %s2780_s17 = sld [smem:[#allocation64_spill]]  ;;  %v496_v45 = vadd.f32 %v495_v12, %v492_v0  ;;  %v581_v0 = vmul.f32 %v580_v16, %v2085_v58  ;;  %v631_v62 = vstv %s2112_s28 }
 0x11f   :  { %v506_v25 = vstv %s2777_s18  ;;  %s2131_s21 = sld [smem:[#allocation9 + $0x25]]  ;;  %v632_v23 = vmul.f32 %v631_v62, %v2109_v2 }
 0x120   :  { %s2784_s0 = sld [smem:[#allocation65_spill]]  ;;  %v500_v18 = vadd.f32 %v499_v44, %v496_v45  ;;  %v507_v19 = vmul.f32 %v506_v25, %v2123_v14  ;;  %v582_v13 = vadd.f32 %v581_v0, %v578_v20  ;;  %v523_v45 = vmul.f32 %v522_v36, %v2168_v35 }
 0x121   :  { %2779 = sst [smem:[#allocation36_spill]] %s2121_s20  ;;  %v527_v44 = vmul.f32 %v526_v42, %v2170_v54  ;;  %v635_v16 = vstv %s2115_s27 }
 0x122   :  { %2781 = sst [smem:[#allocation72_spill]] %s2126_s11  ;;  %v504_v30 = vadd.f32 %v503_v38, %v500_v18  ;;  %v586_v25 = vadd.f32 %v585_v6, %v582_v13  ;;  %v589_v18 = vmul.f32 %v588_v21, %v2109_v2  ;;  %v636_v53 = vmul.f32 %v635_v16, %v2123_v14 }
 0x123   :  { %s2138_s20 = sld [smem:[#allocation9 + $0x26]] }
 0x124   :  { %v510_v26 = vstv %s2780_s17  ;;  %s2143_s11 = sld [smem:[#allocation9 + $0x27]]  ;;  %v508_v49 = vadd.f32 %v507_v19, %v504_v30  ;;  %v590_v29 = vadd.f32 %v589_v18, %v586_v25  ;;  %v618_v30 = vstv %s2092_s7 }
 0x125   :  { %2783 = sst [smem:[#allocation38_spill]] %s2131_s21  ;;  %v511_v63 = vmul.f32 %v510_v26, %v2133_v22  ;;  %v593_v26 = vmul.f32 %v592_v15, %v2123_v14  ;;  %v620_v19 = vstv %s2083_s2  ;;  %v619_v33 = vmul.f32 %v618_v30, %v2080_v52 }
 0x126   :  { %s2785_s18 = sld [smem:[#allocation66_spill]]  ;;  %v514_v32 = vstv %s2784_s0 }
 0x127   :  { %s2149_s21 = sld [smem:[#allocation10 + $0x4]]  ;;  %v512_v3 = vadd.f32 %v511_v63, %v508_v49  ;;  %v515_v48 = vmul.f32 %v514_v32, %v2135_v4  ;;  %v562_v32 = vmul.f32 %v561_v61, %v2145_v57  ;;  %v594_v49 = vadd.f32 %v593_v26, %v590_v29 }
 0x128   :  { %s2154_s17 = sld [smem:[#allocation9 + $0x28]]  ;;  %v597_v63 = vmul.f32 %v596_v27, %v2133_v22 }
 0x129   :  { %s2158_s9 = sld [smem:[#allocation9 + $0x29]]  ;;  %v516_v7 = vadd.f32 %v515_v48, %v512_v3  ;;  %v621_v3 = vadd.f32 %v620_v19, %v619_v33  ;;  %v624_v48 = vmul.f32 %v623_v31, %v2085_v58 }
 0x12a   :  { %s2162_s30 = sld [smem:[#allocation9 + $0x2a]]  ;;  %v598_v8 = vadd.f32 %v597_v63, %v594_v49 }
 0x12b   :  { %s2166_s24 = sld [smem:[#allocation9 + $0x2b]]  ;;  %v625_v46 = vadd.f32 %v624_v48, %v621_v3 }
 0x12c   :  { %v518_v40 = vstv %s2785_s18  ;;  %s2174_s1 = sld [smem:[#allocation9 + $0x2c]] }
 0x12d   :  { %v519_v34 = vmul.f32 %v518_v40, %v2145_v57  ;;  %s2178_s3 = sld [smem:[#allocation9 + $0x2d]]  ;;  %v566_v40 = vmul.f32 %v565_v5, %v2168_v35  ;;  %v663_v20 = vstv %s2149_s21 }
 0x12e   :  { %s2184_s13 = sld [smem:[#allocation9 + $0x2e]]  ;;  %v661_v17 = vstv %s2154_s17 }
 0x12f   :  { %s2189_s14 = sld [smem:[#allocation9 + $0x2f]]  ;;  %v520_v12 = vadd.f32 %v519_v34, %v516_v7  ;;  %v563_v7 = vadd.f32 %v562_v32, %v559_v39  ;;  %v666_v0 = vstv %s2158_s9  ;;  %v662_v21 = vmul.f32 %v661_v17, %v2080_v52 }
 0x130   :  { %s2194_s15 = sld [smem:[#allocation9 + $0x30]]  ;;  %v667_v61 = vmul.f32 %v666_v0, %v2085_v58  ;;  %v651_v39 = vstv %s2138_s20  ;;  %v655_v32 = vstv %s2143_s11 }
 0x131   :  { %s2198_s23 = sld [smem:[#allocation9 + $0x31]]  ;;  %v524_v38 = vadd.f32 %v523_v45, %v520_v12  ;;  %v567_v12 = vadd.f32 %v566_v40, %v563_v7  ;;  %v670_v45 = vstv %s2162_s30  ;;  %v664_v1 = vadd.f32 %v663_v20, %v662_v21 }
 0x132   :  { %s2202_s10 = sld [smem:[#allocation10 + $0x5]]  ;;  %v678_v5 = vstv %s2174_s1  ;;  %v671_v30 = vmul.f32 %v670_v45, %v2101_v47  ;;  %v652_v7 = vmul.f32 %v651_v39, %v2168_v35 }
 0x133   :  { %s2206_s16 = sld [smem:[#allocation9 + $0x32]]  ;;  %v2238_v59 = vadd.f32 %v527_v44, %v524_v38  ;;  %v674_v38 = vstv %s2166_s24  ;;  %v2283_v26 = vadd.f32 %v570_v41, %v567_v12  ;;  %v668_v29 = vadd.f32 %v667_v61, %v664_v1 }
 0x134   :  { %s2211_s12 = sld [smem:[#allocation9 + $0x33]]  ;;  %v675_v49 = vmul.f32 %v674_v38, %v2109_v2  ;;  %v679_v63 = vmul.f32 %v678_v5, %v2123_v14  ;;  %v686_v41 = vstv %s2184_s13 }
 0x135   :  { %s2786_s19 = sld [smem:[#allocation67_spill]]  ;;  %v529_v42 = vmax.f32 %v2238_v59, 0.0  ;;  %v672_v33 = vadd.f32 %v671_v30, %v668_v29  ;;  %v572_v62 = vmax.f32 %v2283_v26, 0.0 }
 0x136   :  { %s2787_s22 = sld [smem:[#allocation71_spill]] }
 0x137   :  { %s2216_s4 = sld [smem:[#allocation9 + $0x34]]  ;;  %v676_v48 = vadd.f32 %v675_v49, %v672_v33 }
 0x138   :  { %s2788_s5 = sld [smem:[#allocation68_spill]]  ;;  %v706_v40 = vstv %s2202_s10 }
 0x139   :  { %s2221_s25 = sld [smem:[#allocation9 + $0x35]] }
 0x13a   :  { %s2226_s26 = sld [smem:[#allocation9 + $0x36]] }
 0x13b   :  { %v600_v50 = vstv %s2786_s19  ;;  %s2231_s8 = sld [smem:[#allocation9 + $0x37]] }
 0x13c   :  { %v627_v51 = vstv %s2787_s22  ;;  %s2789_s7 = sld [smem:[#allocation69_spill]]  ;;  %v601_v34 = vmul.f32 %v600_v50, %v2135_v4  ;;  %v682_v50 = vstv %s2178_s3 }
 0x13d   :  { %s2790_s2 = sld [smem:[#allocation70_spill]]  ;;  %v628_v37 = vmul.f32 %v627_v51, %v2101_v47  ;;  %v704_v51 = vstv %s2206_s16 }
 0x13e   :  { %v604_v28 = vstv %s2788_s5  ;;  %s2236_s29 = sld [smem:[#allocation9 + $0x38]]  ;;  %v602_v36 = vadd.f32 %v601_v34, %v598_v8  ;;  %v705_v8 = vmul.f32 %v704_v51, %v2080_v52  ;;  %v690_v34 = vstv %s2189_s14 }
 0x13f   :  { %s2791_s6 = sld [smem:[#allocation36_spill]]  ;;  %v605_v9 = vmul.f32 %v604_v28, %v2145_v57  ;;  %v629_v60 = vadd.f32 %v628_v37, %v625_v46  ;;  %v709_v28 = vstv %s2211_s12  ;;  %v713_v46 = vstv %s2216_s4 }
 0x140   :  { %s2242_s0 = sld [smem:[#allocation9 + $0x39]]  ;;  %v680_v37 = vadd.f32 %v679_v63, %v676_v48  ;;  %v714_v0 = vmul.f32 %v713_v46, %v2101_v47  ;;  %v691_v12 = vmul.f32 %v690_v34, %v2145_v57 }
 0x141   :  { %s2246_s18 = sld [smem:[#allocation9 + $0x3a]]  ;;  %v633_v56 = vadd.f32 %v632_v23, %v629_v60  ;;  %v606_v44 = vadd.f32 %v605_v9, %v602_v36  ;;  %v683_v9 = vmul.f32 %v682_v50, %v2133_v22  ;;  %v656_v36 = vmul.f32 %v655_v32, %v2170_v54 }
 0x142   :  { %v608_v10 = vstv %s2789_s7  ;;  %s2252_s19 = sld [smem:[#allocation9 + $0x3b]]  ;;  %v687_v60 = vmul.f32 %v686_v41, %v2135_v4  ;;  %v717_v23 = vstv %s2221_s25  ;;  %v725_v45 = vstv %s2231_s8 }
 0x143   :  { %v612_v55 = vstv %s2790_s2  ;;  %s2792_s28 = sld [smem:[#allocation72_spill]]  ;;  %v637_v43 = vadd.f32 %v636_v53, %v633_v56  ;;  %v609_v25 = vmul.f32 %v608_v10, %v2168_v35  ;;  %v707_v10 = vadd.f32 %v706_v40, %v705_v8 }
 0x144   :  { %s2793_s22 = sld [smem:[#allocation38_spill]]  ;;  %v613_v18 = vmul.f32 %v612_v55, %v2170_v54  ;;  %v710_v55 = vmul.f32 %v709_v28, %v2085_v58  ;;  %v684_v17 = vadd.f32 %v683_v9, %v680_v37  ;;  %v694_v56 = vstv %s2194_s15 }
 0x145   :  { %v639_v11 = vstv %s2791_s6  ;;  %s2256_s5 = sld [smem:[#allocation10 + $0x6]]  ;;  %v610_v24 = vadd.f32 %v609_v25, %v606_v44  ;;  %v721_v53 = vstv %s2226_s26  ;;  %v698_v44 = vstv %s2198_s23 }
 0x146   :  { %s2262_s7 = sld [smem:[#allocation9 + $0x3c]]  ;;  %v640_v13 = vmul.f32 %v639_v11, %v2133_v22  ;;  %v711_v20 = vadd.f32 %v710_v55, %v707_v10  ;;  %v722_v38 = vmul.f32 %v721_v53, %v2123_v14  ;;  %v729_v29 = vstv %s2236_s29 }
 0x147   :  { %s2266_s27 = sld [smem:[#allocation9 + $0x3d]]  ;;  %v2318_v16 = vadd.f32 %v613_v18, %v610_v24  ;;  %v733_v32 = vstv %s2242_s0  ;;  %v695_v49 = vmul.f32 %v694_v56, %v2168_v35  ;;  %v699_v40 = vmul.f32 %v698_v44, %v2170_v54 }
 0x148   :  { %s2272_s17 = sld [smem:[#allocation9 + $0x3e]]  ;;  %v641_v27 = vadd.f32 %v640_v13, %v637_v43  ;;  %v688_v13 = vadd.f32 %v687_v60, %v684_v17  ;;  %v734_v48 = vmul.f32 %v733_v32, %v2145_v57  ;;  %v737_v37 = vstv %s2246_s18 }
 0x149   :  { %v643_v6 = vstv %s2792_s28  ;;  %s2275_s21 = sld [smem:[#allocation9 + $0x3f]]  ;;  %v615_v33 = vmax.f32 %v2318_v16, 0.0  ;;  %v741_v9 = vstv %s2252_s19 }
 0x14a   :  { %v647_v15 = vstv %s2793_s22  ;;  %s2281_s9 = sld [smem:[#allocation9 + $0x40]]  ;;  %v644_v19 = vmul.f32 %v643_v6, %v2135_v4  ;;  %v715_v6 = vadd.f32 %v714_v0, %v711_v20  ;;  %v742_v44 = vmul.f32 %v741_v9, %v2170_v54 }
 0x14b   :  { %s2286_s30 = sld [smem:[#allocation9 + $0x41]]  ;;  %v648_v31 = vmul.f32 %v647_v15, %v2145_v57  ;;  %v718_v15 = vmul.f32 %v717_v23, %v2109_v2  ;;  %v749_v1 = vstv %s2256_s5 }
 0x14c   :  { %s2292_s24 = sld [smem:[#allocation9 + $0x42]]  ;;  %v645_v3 = vadd.f32 %v644_v19, %v641_v27  ;;  %v747_v21 = vstv %s2262_s7  ;;  %v726_v27 = vmul.f32 %v725_v45, %v2133_v22  ;;  %v738_v45 = vmul.f32 %v737_v37, %v2168_v35 }
 0x14d   :  { %s2296_s1 = sld [smem:[#allocation9 + $0x43]]  ;;  %v748_v43 = vmul.f32 %v747_v21, %v2080_v52  ;;  %v752_v61 = vstv %s2266_s27  ;;  %v719_v18 = vadd.f32 %v718_v15, %v715_v6 }
 0x14e   :  { %s2302_s2 = sld [smem:[#allocation9 + $0x44]]  ;;  %v649_v11 = vadd.f32 %v648_v31, %v645_v3  ;;  %v756_v5 = vstv %s2272_s17  ;;  %v753_v19 = vmul.f32 %v752_v61, %v2085_v58  ;;  %v692_v31 = vadd.f32 %v691_v12, %v688_v13 }
 0x14f   :  { %s2306_s20 = sld [smem:[#allocation9 + $0x45]]  ;;  %v750_v30 = vadd.f32 %v749_v1, %v748_v43  ;;  %v723_v39 = vadd.f32 %v722_v38, %v719_v18  ;;  %v760_v24 = vstv %s2275_s21  ;;  %v757_v50 = vmul.f32 %v756_v5, %v2101_v47 }
 0x150   :  { %s2312_s11 = sld [smem:[#allocation10 + $0x7]]  ;;  %v653_v25 = vadd.f32 %v652_v7, %v649_v11  ;;  %v730_v3 = vmul.f32 %v729_v29, %v2135_v4  ;;  %v761_v8 = vmul.f32 %v760_v24, %v2109_v2  ;;  %v764_v7 = vstv %s2281_s9 }
 0x151   :  { %s2316_s3 = sld [smem:[#allocation9 + $0x46]]  ;;  %v754_v63 = vadd.f32 %v753_v19, %v750_v30  ;;  %v727_v28 = vadd.f32 %v726_v27, %v723_v39  ;;  %v696_v34 = vadd.f32 %v695_v49, %v692_v31  ;;  %v765_v11 = vmul.f32 %v764_v7, %v2123_v14 }
 0x152   :  { %s2323_s13 = sld [smem:[#allocation9 + $0x47]]  ;;  %v2362_v51 = vadd.f32 %v656_v36, %v653_v25  ;;  %v768_v17 = vstv %s2286_s30  ;;  %v772_v12 = vstv %s2292_s24 }
 0x153   :  { %s2326_s14 = sld [smem:[#allocation9 + $0x48]]  ;;  %v758_v41 = vadd.f32 %v757_v50, %v754_v63  ;;  %v731_v46 = vadd.f32 %v730_v3, %v727_v28  ;;  %v776_v56 = vstv %s2296_s1  ;;  %v2393_v21 = vadd.f32 %v699_v40, %v696_v34 }
 0x154   :  { %s2332_s10 = sld [smem:[#allocation9 + $0x49]]  ;;  %v658_v23 = vmax.f32 %v2362_v51, 0.0  ;;  %v769_v43 = vmul.f32 %v768_v17, %v2133_v22  ;;  %v773_v61 = vmul.f32 %v772_v12, %v2135_v4  ;;  %v780_v25 = vstv %s2302_s2 }
 0x155   :  { %s2336_s16 = sld [smem:[#allocation9 + $0x4a]]  ;;  %v762_v10 = vadd.f32 %v761_v8, %v758_v41  ;;  %v735_v0 = vadd.f32 %v734_v48, %v731_v46  ;;  %v777_v27 = vmul.f32 %v776_v56, %v2145_v57  ;;  %v784_v29 = vstv %s2306_s20 }
 0x156   :  { %s2342_s15 = sld [smem:[#allocation9 + $0x4b]]  ;;  %v792_v36 = vstv %s2312_s11  ;;  %v701_v19 = vmax.f32 %v2393_v21, 0.0  ;;  %v781_v24 = vmul.f32 %v780_v25, %v2168_v35 }
 0x157   :  { %s2346_s12 = sld [smem:[#allocation9 + $0x4c]]  ;;  %v790_v55 = vstv %s2316_s3  ;;  %v766_v13 = vadd.f32 %v765_v11, %v762_v10  ;;  %v739_v5 = vadd.f32 %v738_v45, %v735_v0 }
 0x158   :  { %s2351_s23 = sld [smem:[#allocation9 + $0x4d]]  ;;  %v795_v60 = vstv %s2323_s13  ;;  %v791_v20 = vmul.f32 %v790_v55, %v2080_v52  ;;  %v2440_v55 = vmul.f32 %v784_v29, %v2170_v54 }
 0x159   :  { %s2355_s4 = sld [smem:[#allocation9 + $0x4e]]  ;;  %v799_v53 = vstv %s2326_s14  ;;  %v796_v15 = vmul.f32 %v795_v60, %v2085_v58  ;;  %v770_v31 = vadd.f32 %v769_v43, %v766_v13  ;;  %v2429_v41 = vadd.f32 %v742_v44, %v739_v5 }
 0x15a   :  { %s2360_s25 = sld [smem:[#allocation9 + $0x4f]]  ;;  %v793_v6 = vadd.f32 %v792_v36, %v791_v20  ;;  %v803_v1 = vstv %s2332_s10  ;;  %v800_v38 = vmul.f32 %v799_v53, %v2101_v47 }
 0x15b   :  { %s2366_s26 = sld [smem:[#allocation10 + $0x8]]  ;;  %v807_v30 = vstv %s2336_s16  ;;  %v804_v32 = vmul.f32 %v803_v1, %v2109_v2  ;;  %v774_v46 = vadd.f32 %v773_v61, %v770_v31  ;;  %v744_v56 = vmax.f32 %v2429_v41, 0.0 }
 0x15c   :  { %s2371_s8 = sld [smem:[#allocation9 + $0x50]]  ;;  %v797_v18 = vadd.f32 %v796_v15, %v793_v6  ;;  %v808_v28 = vmul.f32 %v807_v30, %v2123_v14  ;;  %v811_v3 = vstv %s2342_s15 }
 0x15d   :  { %s2375_s29 = sld [smem:[#allocation9 + $0x51]]  ;;  %v815_v8 = vstv %s2346_s12  ;;  %v812_v36 = vmul.f32 %v811_v3, %v2133_v22  ;;  %v778_v15 = vadd.f32 %v777_v27, %v774_v46 }
 0x15e   :  { %s2380_s6 = sld [smem:[#allocation9 + $0x52]]  ;;  %v801_v39 = vadd.f32 %v800_v38, %v797_v18  ;;  %v819_v7 = vstv %s2351_s23  ;;  %v816_v17 = vmul.f32 %v815_v8, %v2135_v4 }
 0x15f   :  { %s2386_s0 = sld [smem:[#allocation9 + $0x53]]  ;;  %v823_v60 = vstv %s2355_s4  ;;  %v820_v20 = vmul.f32 %v819_v7, %v2145_v57 }
 0x160   :  { %s2391_s18 = sld [smem:[#allocation9 + $0x54]]  ;;  %v805_v40 = vadd.f32 %v804_v32, %v801_v39  ;;  %v827_v13 = vstv %s2360_s25  ;;  %v824_v45 = vmul.f32 %v823_v60, %v2168_v35 }
 0x161   :  { %s2396_s19 = sld [smem:[#allocation9 + $0x55]]  ;;  %v835_v63 = vstv %s2366_s26  ;;  %v828_v31 = vmul.f32 %v827_v13, %v2170_v54 }
 0x162   :  { %s2402_s28 = sld [smem:[#allocation9 + $0x56]]  ;;  %v833_v49 = vstv %s2371_s8  ;;  %v809_v37 = vadd.f32 %v808_v28, %v805_v40 }
 0x163   :  { %s2407_s22 = sld [smem:[#allocation9 + $0x57]]  ;;  %v838_v50 = vstv %s2375_s29  ;;  %v834_v48 = vmul.f32 %v833_v49, %v2080_v52 }
 0x164   :  { %s2412_s5 = sld [smem:[#allocation10 + $0x9]]  ;;  %v842_v34 = vstv %s2380_s6  ;;  %v839_v10 = vmul.f32 %v838_v50, %v2085_v58  ;;  %v813_v53 = vadd.f32 %v812_v36, %v809_v37 }
 0x165   :  { %s2416_s7 = sld [smem:[#allocation9 + $0x5a]]  ;;  %v836_v9 = vadd.f32 %v835_v63, %v834_v48  ;;  %v846_v11 = vstv %s2386_s0  ;;  %v843_v12 = vmul.f32 %v842_v34, %v2101_v47  ;;  %s1408_s0 = smov [#allocation17]  }
 0x166   :  { %s2422_s27 = sld [smem:[#allocation9 + $0x5b]]  ;;  %v850_v6 = vstv %s2391_s18  ;;  %v847_v43 = vmul.f32 %v846_v11, %v2109_v2  ;;  %v817_v30 = vadd.f32 %v816_v17, %v813_v53  ;;  %s987_s18 = sshll.u32 %s1408_s0, 4  ;;  %s988_s18 = int_to_ptr.vmem [resolvable:$true] %s987_s18 }
 0x167   :  { %s2427_s17 = sld [smem:[#allocation9 + $0x58]]  ;;  %v840_v0 = vadd.f32 %v839_v10, %v836_v9  ;;  %v854_v1 = vstv %s2396_s19  ;;  %v851_v5 = vmul.f32 %v850_v6, %v2123_v14 }
 0x168   :  { %s2434_s21 = sld [smem:[#allocation9 + $0x5c]]  ;;  %v858_v27 = vstv %s2402_s28  ;;  %v855_v63 = vmul.f32 %v854_v1, %v2133_v22 }
 0x169   :  { %s2437_s9 = sld [smem:[#allocation9 + $0x59]]  ;;  %v844_v44 = vadd.f32 %v843_v12, %v840_v0  ;;  %v862_v39 = vstv %s2407_s22  ;;  %v859_v28 = vmul.f32 %v858_v27, %v2135_v4 }
 0x16a   :  { %s2445_s30 = sld [smem:[#allocation9 + $0x5d]]  ;;  %v878_v25 = vstv %s2412_s5  ;;  %v863_v7 = vmul.f32 %v862_v39, %v2145_v57 }
 0x16b   :  { %s2450_s24 = sld [smem:[#allocation9 + $0x5e]]  ;;  %v876_v61 = vstv %s2416_s7  ;;  %v848_v38 = vadd.f32 %v847_v43, %v844_v44  ;;  %s1409_s7 = smov 1  }
 0x16c   :  { %s2455_s1 = sld [smem:[#allocation12]]  ;;  %v881_v18 = vstv %s2422_s27  ;;  %v877_v29 = vmul.f32 %v876_v61, %v2080_v52  ;;  %v782_v52 = vadd.f32 %v781_v24, %v778_v15  ;;  %s1410_s27 = smov [#allocation16]  }
 0x16d   :  { %s2459_s2 = sld [smem:[#allocation9 + $0x5f]]  ;;  %v852_v49 = vadd.f32 %v851_v5, %v848_v38  ;;  %v882_v40 = vmul.f32 %v881_v18, %v2085_v58  ;;  %v866_v3 = vstv %s2427_s17  ;;  %v821_v58 = vadd.f32 %v820_v20, %v817_v30  ;;  %s976_s17 = sshll.u32 %s1410_s27, 4  ;;  %s977_s17 = int_to_ptr.vmem [resolvable:$true] %s976_s17 }
 0x16e   :  { %s2465_s20 = sld [smem:[#allocation12 + $0x1]]  ;;  %v885_v32 = vstv %s2434_s21  ;;  %v879_v50 = vadd.f32 %v878_v25, %v877_v29  ;;  %v867_v36 = vmul.f32 %v866_v3, %v2168_v35 }
 0x16f   :  { %s2470_s11 = sld [smem:[#allocation12 + $0x2]]  ;;  %v856_v8 = vadd.f32 %v855_v63, %v852_v49  ;;  %v886_v46 = vmul.f32 %v885_v32, %v2101_v47  ;;  %v870_v37 = vstv %s2437_s9  ;;  %v825_v6 = vadd.f32 %v824_v45, %v821_v58 }
 0x170   :  { %s2475_s3 = sld [smem:[#allocation9 + $0x60]]  ;;  %v889_v48 = vstv %s2445_s30  ;;  %v883_v34 = vadd.f32 %v882_v40, %v879_v50  ;;  %v871_v26 = vmul.f32 %v870_v37, %v2170_v54 }
 0x171   :  { %s2479_s13 = sld [smem:[#allocation12 + $0x3]]  ;;  %v893_v9 = vstv %s2450_s24  ;;  %v860_v10 = vadd.f32 %v859_v28, %v856_v8  ;;  %v890_v11 = vmul.f32 %v889_v48, %v2109_v2 }
 0x172   :  { %s2484_s14 = sld [smem:[#allocation9 + $0x61]]  ;;  %v919_v24 = vstv %s2455_s1  ;;  %v887_v60 = vadd.f32 %v886_v46, %v883_v34  ;;  %v894_v13 = vmul.f32 %v893_v9, %v2123_v14 }
 0x173   :  { %s2488_s10 = sld [smem:[#allocation12 + $0x4]]  ;;  %v897_v47 = vstv %s2459_s2  ;;  %v920_v17 = vmul.f32 %v919_v24, %v529_v42  ;;  %v864_v12 = vadd.f32 %v863_v7, %v860_v10  ;;  %v786_v42 = vadd.f32 %v2440_v55, %v782_v52 }
 0x174   :  { %s2492_s16 = sld [smem:[#allocation9 + $0x62]]  ;;  %v924_v0 = vstv %s2465_s20  ;;  %v891_v53 = vadd.f32 %v890_v11, %v887_v60  ;;  %v898_v1 = vmul.f32 %v897_v47, %v2133_v22  ;;  %v829_v22 = vadd.f32 %v828_v31, %v825_v6 }
 0x175   :  { %s2497_s15 = sld [smem:[#allocation12 + $0x5]]  ;;  %v928_v2 = vstv %s2470_s11  ;;  %v925_v59 = vmul.f32 %v924_v0, %v572_v62  ;;  %v868_v14 = vadd.f32 %v867_v36, %v864_v12  ;;  %v787_v30 = vmax.f32 %v786_v42, 0.0 }
 0x176   :  { %s2500_s12 = sld [smem:[#allocation9 + $0x63]]  ;;  %v901_v15 = vstv %s2475_s3  ;;  %v895_v43 = vadd.f32 %v894_v13, %v891_v53  ;;  %v929_v45 = vmul.f32 %v928_v2, %v615_v33  ;;  %v830_v51 = vmax.f32 %v829_v22, 0.0 }
 0x177   :  { %s2794_s25 = sld [smem:[#allocation81_spill]]  ;;  %v932_v61 = vstv %s2479_s13  ;;  %v902_v38 = vmul.f32 %v901_v15, %v2135_v4  ;;  %v872_v32 = vadd.f32 %v871_v26, %v868_v14 }
 0x178   :  { %s2510_s26 = sld [smem:[#allocation12 + $0x6]]  ;;  %v905_v25 = vstv %s2484_s14  ;;  %v899_v62 = vadd.f32 %v898_v1, %v895_v43  ;;  %v933_v29 = vmul.f32 %v932_v61, %v658_v23 }
 0x179   :  { %s2518_s8 = sld [smem:[#allocation12 + $0x7]]  ;;  %v936_v55 = vstv %s2488_s10  ;;  %v906_v16 = vmul.f32 %v905_v25, %v2145_v57  ;;  %v873_v48 = vmax.f32 %v872_v32, 0.0 }
 0x17a   :  { %s2526_s29 = sld [smem:[#allocation12 + $0x8]]  ;;  %v909_v5 = vstv %s2492_s16  ;;  %v903_v39 = vadd.f32 %v902_v38, %v899_v62  ;;  %v937_v63 = vmul.f32 %v936_v55, %v701_v19 }
 0x17b   :  { %v940_v33 = vstv %s2497_s15  ;;  %s1212_s6 = sld [smem:[#allocation12 + $0x9]]  ;;  %v910_v50 = vmul.f32 %v909_v5, %v2168_v35 }
 0x17c   :  { %v913_v49 = vstv %s2500_s12  ;;  %v907_v31 = vadd.f32 %v906_v16, %v903_v39  ;;  %v941_v52 = vmul.f32 %v940_v33, %v744_v56  ;;  %s2795_s22 = sld [smem:[#allocation83_spill]]  ;;  %v961_v56 = vlaneseq }
 0x17d   :  { %v921_v20 = vstv %s2794_s25  ;;  %v914_v57 = vmul.f32 %v913_v49, %v2170_v54  ;;  %s2796_s30 = sld [smem:[#allocation82_spill]] }
 0x17e   :  { %v922_v44 = vadd.f32 %v921_v20, %v920_v17  ;;  %v944_v40 = vstv %s2510_s26  ;;  %v911_v28 = vadd.f32 %v910_v50, %v907_v31  ;;  %v962_v60 = vand.u32 127, %v961_v56  ;;  %v2797_v20 = vld [vmem:[#allocation79_spill] sm:$0xff] }
 0x17f   :  { %v948_v3 = vstv %s2518_s8  ;;  %v945_v7 = vmul.f32 %v944_v40, %v787_v30 }
 0x180   :  { %v926_v18 = vadd.f32 %v925_v59, %v922_v44  ;;  %v915_v34 = vadd.f32 %v914_v57, %v911_v28  ;;  %v952_v46 = vstv %s2526_s29  ;;  %v949_v19 = vmul.f32 %v948_v3, %v830_v51 }
 0x181   :  { %v956_v37 = vstv %s1212_s6  ;;  %v953_v9 = vmul.f32 %v952_v46, %v873_v48  ;;  %vm963_vm0 = vcmp.eq.s32.totalorder %v962_v60, 0 }
 0x182   :  { %v930_v27 = vadd.f32 %v929_v45, %v926_v18  ;;  %v916_v58 = vmax.f32 %v915_v34, 0.0  ;;  %s989_s5 = sshll.u32 %s2795_s22, 4  ;;  %s990_s5 = int_to_ptr.hbm [resolvable:$true] %s989_s5 }
 0x183   :  { %s978_s24 = sshll.u32 %s2796_s30, 4  ;;  %s979_s24 = int_to_ptr.hbm [resolvable:$true] %s978_s24 }
 0x184   :  { %v934_v4 = vadd.f32 %v933_v29, %v930_v27  ;;  %v957_v10 = vmul.f32 %v956_v37, %v916_v58 }
 0x186   :  { %v938_v23 = vadd.f32 %v937_v63, %v934_v4 }
 0x188   :  { %v942_v8 = vadd.f32 %v941_v52, %v938_v23 }
 0x18a   :  { %v946_v21 = vadd.f32 %v945_v7, %v942_v8 }
 0x18c   :  { %v950_v35 = vadd.f32 %v949_v19, %v946_v21 }
 0x18e   :  { %v954_v24 = vadd.f32 %v953_v9, %v950_v35 }
 0x190   :  { %v958_v36 = vadd.f32 %v957_v10, %v954_v24 }
 0x192   :  { %v959_v54 = vmax.f32 %v958_v36, 0.0 }
 0x194   :  { %v960_v41 = vmin.f32 %v959_v54, 0.5 }
 0x196   :  { %964 = vrot.lane.b32.xlu0 %v960_v41, %s1409_s7  ;;  %970 = vst [vmem:[#allocation17] sm:$0xff] %v960_v41 }
 0x197   :  { %992 = dma.vmem_to_hbm [thread:$0]  %s988_s18, 128, %s990_s5, [#allocation18]  }
 0x208   :  { %v965_v11 = vpop.permute.xlu0 %964 }
 0x209   :  { %v966_v47 = vsub.f32 %v960_v41, %v965_v11 }
 0x20b   :  { %v967_v17 = vsel %vm963_vm0, 0.0, %v966_v47 }
 0x20c   :  { %v968_v0 = vsub.f32 %v2797_v20, %v967_v17 }
 0x20e   :  { %969 = vst [vmem:[#allocation16] sm:$0xff] %v968_v0 }
 0x20f   :  { %981 = dma.vmem_to_hbm [thread:$0]  %s977_s17, 128, %s979_s24, [#allocation5]  }
 0x210   :  { %1394 = dma.done.wait [#allocation5], 128  }
 0x211   :  { %1395 = vsyncadd [#allocation5], 4294967168 }
 0x212   :  { %1396 = dma.done.wait [#allocation18], 128  }
 0x213   :  { %1397 = vsyncadd [#allocation18], 4294967168 }
 0x214   :  { %1001 = vsyncpa [#allocation4], 1 }
 0x215   :  { %1002 = vsyncpa [#allocation15], 1 }
 0x216   :  { %1003 = vsyncpa [#allocation5], 1 }
 0x217   :  { %1004 = vsyncpa [#allocation18], 1 }
 0x218   :  { %1005 = vsyncpa [#allocation6], 1 }
 0x219   :  { %1006 = vsyncpa [#allocation8], 1 }
 0x21a   :  { %1007 = vsyncpa [#allocation11], 1 }

</bundles_post_ra>
